<compile_context>
chip_gen: v7x
topology: tpu7x:2x2x1
jax: 0.10.0
libtpu: 0.0.40
codegen_flags: <defaults>
</compile_context>

<pallas_src>
import functools

import jax
import jax.numpy as jnp
from jax.experimental import pallas as pl
from jax.experimental.pallas import tpu as pltpu


def _round_up(a, b):
    return ((a + b - 1) // b) * b


def _choose_band(out_h, out_w, cp, coutp, budget_bytes=8 << 20):
    """Rows-per-band TH (dividing out_h) so the per-band f32 working set stays bounded."""
    per_row = out_w * (cp + 2 * coutp) * 4          # acc + matmul result (+ slack) per output row
    max_rows = max(1, budget_bytes // max(per_row, 1))
    if out_h <= max_rows:
        return out_h, 1
    for th in range(min(out_h, max_rows), 0, -1):
        # When banded, the bf16 y block needs (TH*out_w) % 16 == 0 (sublane packing of bf16).
        if out_h % th == 0 and (th * out_w) % 16 == 0:
            return th, out_h // th
    # TODO(synk): halo'd input banding via manual DMA for images whose padded input alone
    # exceeds VMEM; plain BlockSpec cannot express overlapping (halo) input windows.
    return out_h, 1


# ----------------------------------------------------------------------------
# Kernel 1: fused ReLU + dilated depthwise KxK conv + 1x1 conv (bf16 MXU) and
# per-(image, band) BatchNorm partial statistics. Channels on the 128-lane axis.
# ----------------------------------------------------------------------------
def _relu_dwconv_pw_kernel(x_ref, wdw_ref, wpw_ref, y_ref, stats_ref, *,
                           th, out_w, ksize, stride, dilation):
    # x_ref:     (1, Hp, Wp, Cp)       padded input, resident per image across the band axis
    # wdw_ref:   (K, K, Cp)            depthwise weights (channel on lanes), f32
    # wpw_ref:   (Cp, Coutp)           1x1 conv weights, bf16
    # y_ref:     (1, TH*out_w, Coutp)  pre-BN output band, bf16, lane-dense store
    # stats_ref: (1, 1, 2, Coutp)      per-(image, band) [sum, centered M2] BN partials, f32
    cp = x_ref.shape[-1]
    t = pl.program_id(1)
    h_base = t * (th * stride)

    wdw = wdw_ref[...]                                           # small, load once
    acc = jnp.zeros((th, out_w, cp), jnp.float32)
    for kh in range(ksize):
        for kw in range(ksize):
            h0 = h_base + kh * dilation
            w0 = kw * dilation
            if stride == 1:
                hs, ws = pl.ds(h0, th), pl.ds(w0, out_w)
            else:                                                # stride never on the lane axis
                hs, ws = pl.ds(h0, th, stride), pl.ds(w0, out_w, stride)
            tap = x_ref[0, hs, ws, :]                            # ref-sourced load, no big copies
            tap = jnp.maximum(tap.astype(jnp.float32), 0.0)      # ReLU per tap: cheap VALU filler
            acc = acc + tap * wdw[kh, kw].reshape(1, 1, cp)      # lane-dense VPU broadcast-FMA

    hw_t = th * out_w
    # 1x1 conv == one bf16 MXU matmul with f32 accumulation. Result stays (HW, Coutp): no
    # in-kernel transpose here (moved to the bandwidth-bound epilogue).
    y = jnp.dot(acc.reshape(hw_t, cp).astype(jnp.bfloat16), wpw_ref[...],
                preferred_element_type=jnp.float32)              # (hw_t, Coutp)

    # BN partials for this (image, band): sum and *centered* M2 (no sum-of-squares cancellation).
    s = jnp.sum(y, axis=0, keepdims=True)                        # (1, Coutp) sublane reduction
    d = y - s * (1.0 / hw_t)
    m2 = jnp.sum(d * d, axis=0, keepdims=True)
    stats_ref[0, 0] = jnp.concatenate([s, m2], axis=0)           # (2, Coutp)

    y_ref[0] = y.astype(y_ref.dtype)                             # bf16 intermediate, lane-dense


# ----------------------------------------------------------------------------
# Kernel 2: BatchNorm epilogue. Pure scale-and-add + the single NCHW transpose,
# using scale/shift precomputed once in the wrapper from the global batch stats.
# ----------------------------------------------------------------------------
def _bn_epilogue_kernel(scale_ref, shift_ref, y_ref, o_ref, *, c_out):
    # scale/shift: (1, Coutp);  y: (1, HW, Coutp) bf16;  o: (1, C_out, HW)
    z = y_ref[0].astype(jnp.float32) * scale_ref[...] + shift_ref[...]     # lane broadcast
    o_ref[0] = jnp.transpose(z)[:c_out, :].astype(o_ref.dtype)             # (C_out, HW)


# ----------------------------------------------------------------------------
# DilConv forward.
# ----------------------------------------------------------------------------
def dilconv_forward(x, params, *, kernel_size, stride, padding, dilation, eps=1e-5):
    """x: (N, C, H, W). params = (w_dw (C,K,K), w_pw (C_out,C), gamma (C_out,), beta (C_out,))."""
    w_dw, w_pw, gamma, beta = params
    N, C, H, W = x.shape
    C_out = w_pw.shape[0]
    K, P, S, D = kernel_size, padding, stride, dilation

    out_h = (H + 2 * P - D * (K - 1) - 1) // S + 1
    out_w = (W + 2 * P - D * (K - 1) - 1) // S + 1
    hw = out_h * out_w

    LANE = 128
    cp = _round_up(C, LANE)
    coutp = _round_up(C_out, LANE)   # (v6e/v7x: round to 256 only pays once the kernel is MXU-bound)
    th, n_bands = _choose_band(out_h, out_w, cp, coutp)
    hw_t = th * out_w

    # Boundary layout ops in plain XLA: NCHW->NHWC, spatial zero-pad, channel pad to lanes.
    xp = jnp.pad(jnp.transpose(x, (0, 2, 3, 1)).astype(jnp.float32),
                 ((0, 0), (P, P), (P, P), (0, cp - C)))
    hp, wp = H + 2 * P, W + 2 * P
    wdw_p = jnp.pad(jnp.transpose(w_dw, (1, 2, 0)).astype(jnp.float32),
                    ((0, 0), (0, 0), (0, cp - C)))                               # (K, K, Cp)
    wpw_p = jnp.pad(jnp.transpose(w_pw, (1, 0)),
                    ((0, cp - C), (0, coutp - C_out))).astype(jnp.bfloat16)      # (Cp, Coutp) bf16

    vmem_limit = 48 * 1024 * 1024    # above all scoped defaults, headroom under v7x's 64 MiB

    y, stats = pl.pallas_call(
        functools.partial(_relu_dwconv_pw_kernel, th=th, out_w=out_w,
                          ksize=K, stride=S, dilation=D),
        out_shape=(jax.ShapeDtypeStruct((N, hw, coutp), jnp.bfloat16),
                   jax.ShapeDtypeStruct((N, n_bands, 2, coutp), jnp.float32)),
        grid=(N, n_bands),
        in_specs=[
            pl.BlockSpec((1, hp, wp, cp), lambda n, t: (n, 0, 0, 0)),  # image resident over bands
            pl.BlockSpec((K, K, cp), lambda n, t: (0, 0, 0)),          # weights resident
            pl.BlockSpec((cp, coutp), lambda n, t: (0, 0)),
        ],
        out_specs=(
            pl.BlockSpec((1, hw_t, coutp), lambda n, t: (n, t, 0)),
            pl.BlockSpec((1, 1, 2, coutp), lambda n, t: (n, t, 0, 0)),
        ),
        compiler_params=pltpu.CompilerParams(
            dimension_semantics=("parallel", "arbitrary"),
            vmem_limit_bytes=vmem_limit),
    )(xp, wdw_p, wpw_p)

    # Combine per-(image, band) [sum, M2] partials (Chan) in plain JAX on tiny arrays and
    # compute BN train-mode scale/shift once (biased variance, eps=1e-5 — matches nn.BatchNorm2d).
    n_total = N * hw
    s_b = stats[:, :, 0, :]                                   # (N, n_bands, Coutp)
    m2_b = stats[:, :, 1, :]
    mean = jnp.sum(s_b, axis=(0, 1)) / n_total                # (Coutp,)
    mean_b = s_b / hw_t
    m2 = jnp.sum(m2_b, axis=(0, 1)) + hw_t * jnp.sum((mean_b - mean) ** 2, axis=(0, 1))
    var = m2 / n_total
    inv_std = jax.lax.rsqrt(var + eps)
    gamma_p = jnp.pad(gamma.astype(jnp.float32), (0, coutp - C_out))
    beta_p = jnp.pad(beta.astype(jnp.float32), (0, coutp - C_out))
    scale = (gamma_p * inv_std).reshape(1, coutp)
    shift = (beta_p - mean * gamma_p * inv_std).reshape(1, coutp)

    out = pl.pallas_call(
        functools.partial(_bn_epilogue_kernel, c_out=C_out),
        out_shape=jax.ShapeDtypeStruct((N, C_out, hw), x.dtype),
        grid=(N,),
        in_specs=[
            pl.BlockSpec((1, coutp), lambda n: (0, 0)),
            pl.BlockSpec((1, coutp), lambda n: (0, 0)),
            pl.BlockSpec((1, hw, coutp), lambda n: (n, 0, 0)),
        ],
        out_specs=pl.BlockSpec((1, C_out, hw), lambda n: (n, 0, 0)),
        compiler_params=pltpu.CompilerParams(
            dimension_semantics=("parallel",),
            vmem_limit_bytes=vmem_limit),
    )(scale, shift, y)

    return out.reshape(N, C_out, out_h, out_w)                # already NCHW, free reshape


# ----------------------------------------------------------------------------
# Pure-JAX reference (in-script verification only).
# ----------------------------------------------------------------------------
def _ref_forward(x, params, *, kernel_size, stride, padding, dilation, eps=1e-5):
    w_dw, w_pw, gamma, beta = params
    C = x.shape[1]
    dn = ("NCHW", "OIHW", "NCHW")
    hi = jax.lax.Precision.HIGHEST
    t = jnp.maximum(x, 0.0)
    t = jax.lax.conv_general_dilated(
        t, w_dw[:, None], (stride, stride), [(padding, padding)] * 2,
        rhs_dilation=(dilation, dilation), dimension_numbers=dn,
        feature_group_count=C, precision=hi)
    t = jax.lax.conv_general_dilated(
        t, w_pw[:, :, None, None], (1, 1), [(0, 0)] * 2,
        dimension_numbers=dn, precision=hi)
    mean = jnp.mean(t, axis=(0, 2, 3), keepdims=True)
    var = jnp.mean((t - mean) ** 2, axis=(0, 2, 3), keepdims=True)
    return ((t - mean) * jax.lax.rsqrt(var + eps) * gamma[None, :, None, None]
            + beta[None, :, None, None])


if __name__ == "__main__":
    # Standard DARTS dil_conv_3x3 hyper-parameters at a small deterministic shape.
    N, C_IN, C_OUT, H, W = 2, 4, 8, 16, 16
    KSIZE, STRIDE, PAD, DIL = 3, 1, 2, 2

    key = jax.random.PRNGKey(0)
    ks = jax.random.split(key, 5)
    x = jax.random.normal(ks[0], (N, C_IN, H, W), jnp.float32)

    # Parameter shapes follow nn.Conv2d(groups=C) / nn.Conv2d(1x1) / nn.BatchNorm2d(affine=True).
    w_dw = jax.random.normal(ks[1], (C_IN, KSIZE, KSIZE), jnp.float32) * 0.2   # depthwise (C,1,K,K)
    w_pw = jax.random.normal(ks[2], (C_OUT, C_IN), jnp.float32) * 0.2          # pointwise (Cout,C,1,1)
    gamma = 1.0 + 0.1 * jax.random.normal(ks[3], (C_OUT,), jnp.float32)        # BN gamma
    beta = 0.1 * jax.random.normal(ks[4], (C_OUT,), jnp.float32)               # BN beta
    params = (w_dw, w_pw, gamma, beta)

    out = dilconv_forward(x, params, kernel_size=KSIZE, stride=STRIDE,
                          padding=PAD, dilation=DIL)
    out = jax.block_until_ready(out)

    ref = _ref_forward(x, params, kernel_size=KSIZE, stride=STRIDE,
                       padding=PAD, dilation=DIL)
    exp_h = (H + 2 * PAD - DIL * (KSIZE - 1) - 1) // STRIDE + 1
    exp_w = (W + 2 * PAD - DIL * (KSIZE - 1) - 1) // STRIDE + 1
    assert out.shape == ref.shape == (N, C_OUT, exp_h, exp_w), (out.shape, ref.shape)
    max_err = float(jnp.max(jnp.abs(out - ref)))
    # bf16 MXU operands + bf16 intermediate -> ~3e-2 tolerance envelope.
    assert bool(jnp.allclose(out, ref, atol=3e-2, rtol=3e-2)), max_err

    print("KERNEL_OK")
</pallas_src>

<mosaic_0001>
module attributes {stable_mosaic.version = 11 : i64} {
  func.func @_relu_dwconv_pw_kernel(%arg0: i32, %arg1: i32, %arg2: memref<1x20x20x128xf32, #tpu.memory_space<vmem>>, %arg3: memref<3x3x128xf32, #tpu.memory_space<vmem>>, %arg4: memref<128x128xbf16, #tpu.memory_space<vmem>>, %arg5: memref<1x256x128xbf16, #tpu.memory_space<vmem>>, %arg6: memref<1x1x2x128xf32, #tpu.memory_space<vmem>>) attributes {dimension_semantics = [#tpu.dimension_semantics<parallel>, #tpu.dimension_semantics<arbitrary>], iteration_bounds = array<i64: 2, 1>, scalar_prefetch = 0 : i64, scratch_operands = 0 : i64, tpu.core_type = #tpu.core_type<tc>, window_params = [{transform_indices = @transform_0, window_bounds = array<i64: 1, 20, 20, 128>}, {pipeline_mode = #tpu.pipeline_mode<synchronous>, transform_indices = @transform_1, window_bounds = array<i64: 3, 3, 128>}, {pipeline_mode = #tpu.pipeline_mode<synchronous>, transform_indices = @transform_2, window_bounds = array<i64: 128, 128>}, {transform_indices = @transform_3, window_bounds = array<i64: 1, 256, 128>}, {transform_indices = @transform_4, window_bounds = array<i64: 1, 1, 2, 128>}]} {
    %c16_i32 = arith.constant 16 : i32
    %0 = arith.muli %arg1, %c16_i32 : i32
    %c0 = arith.constant 0 : index
    %c0_0 = arith.constant 0 : index
    %c0_1 = arith.constant 0 : index
    %1 = vector.load %arg3[%c0, %c0_0, %c0_1] : memref<3x3x128xf32, #tpu.memory_space<vmem>>, vector<3x3x128xf32>
    %cst = arith.constant 0.000000e+00 : f32
    %2 = vector.broadcast %cst : f32 to vector<16x16x128xf32>
    %c0_i32 = arith.constant 0 : i32
    %3 = arith.addi %0, %c0_i32 : i32
    %c0_2 = arith.constant 0 : index
    %4 = arith.index_cast %3 : i32 to index
    %c0_3 = arith.constant 0 : index
    %c0_4 = arith.constant 0 : index
    %5 = vector.load %arg2[%c0_2, %4, %c0_3, %c0_4] : memref<1x20x20x128xf32, #tpu.memory_space<vmem>>, vector<1x16x16x128xf32>
    %6 = vector.shape_cast %5 : vector<1x16x16x128xf32> to vector<16x16x128xf32>
    %cst_5 = arith.constant 0.000000e+00 : f32
    %7 = vector.broadcast %cst_5 : f32 to vector<16x16x128xf32>
    %8 = arith.maximumf %6, %7 : vector<16x16x128xf32>
    %9 = vector.extract_strided_slice %1 {offsets = [0, 0, 0], sizes = [1, 1, 128], strides = [1, 1, 1]} : vector<3x3x128xf32> to vector<1x1x128xf32>
    %10 = vector.shape_cast %9 : vector<1x1x128xf32> to vector<128xf32>
    %11 = vector.shape_cast %10 : vector<128xf32> to vector<1x1x128xf32>
    %12 = vector.broadcast %11 : vector<1x1x128xf32> to vector<16x16x128xf32>
    %13 = arith.mulf %8, %12 : vector<16x16x128xf32>
    %14 = arith.addf %2, %13 : vector<16x16x128xf32>
    %c0_i32_6 = arith.constant 0 : i32
    %15 = arith.addi %0, %c0_i32_6 : i32
    %c0_7 = arith.constant 0 : index
    %16 = arith.index_cast %15 : i32 to index
    %c2 = arith.constant 2 : index
    %c0_8 = arith.constant 0 : index
    %17 = vector.load %arg2[%c0_7, %16, %c2, %c0_8] : memref<1x20x20x128xf32, #tpu.memory_space<vmem>>, vector<1x16x16x128xf32>
    %18 = vector.shape_cast %17 : vector<1x16x16x128xf32> to vector<16x16x128xf32>
    %cst_9 = arith.constant 0.000000e+00 : f32
    %19 = vector.broadcast %cst_9 : f32 to vector<16x16x128xf32>
    %20 = arith.maximumf %18, %19 : vector<16x16x128xf32>
    %21 = vector.extract_strided_slice %1 {offsets = [0, 1, 0], sizes = [1, 1, 128], strides = [1, 1, 1]} : vector<3x3x128xf32> to vector<1x1x128xf32>
    %22 = vector.shape_cast %21 : vector<1x1x128xf32> to vector<128xf32>
    %23 = vector.shape_cast %22 : vector<128xf32> to vector<1x1x128xf32>
    %24 = vector.broadcast %23 : vector<1x1x128xf32> to vector<16x16x128xf32>
    %25 = arith.mulf %20, %24 : vector<16x16x128xf32>
    %26 = arith.addf %14, %25 : vector<16x16x128xf32>
    %c0_i32_10 = arith.constant 0 : i32
    %27 = arith.addi %0, %c0_i32_10 : i32
    %c0_11 = arith.constant 0 : index
    %28 = arith.index_cast %27 : i32 to index
    %c4 = arith.constant 4 : index
    %c0_12 = arith.constant 0 : index
    %29 = vector.load %arg2[%c0_11, %28, %c4, %c0_12] : memref<1x20x20x128xf32, #tpu.memory_space<vmem>>, vector<1x16x16x128xf32>
    %30 = vector.shape_cast %29 : vector<1x16x16x128xf32> to vector<16x16x128xf32>
    %cst_13 = arith.constant 0.000000e+00 : f32
    %31 = vector.broadcast %cst_13 : f32 to vector<16x16x128xf32>
    %32 = arith.maximumf %30, %31 : vector<16x16x128xf32>
    %33 = vector.extract_strided_slice %1 {offsets = [0, 2, 0], sizes = [1, 1, 128], strides = [1, 1, 1]} : vector<3x3x128xf32> to vector<1x1x128xf32>
    %34 = vector.shape_cast %33 : vector<1x1x128xf32> to vector<128xf32>
    %35 = vector.shape_cast %34 : vector<128xf32> to vector<1x1x128xf32>
    %36 = vector.broadcast %35 : vector<1x1x128xf32> to vector<16x16x128xf32>
    %37 = arith.mulf %32, %36 : vector<16x16x128xf32>
    %38 = arith.addf %26, %37 : vector<16x16x128xf32>
    %c2_i32 = arith.constant 2 : i32
    %39 = arith.addi %0, %c2_i32 : i32
    %c0_14 = arith.constant 0 : index
    %40 = arith.index_cast %39 : i32 to index
    %c0_15 = arith.constant 0 : index
    %c0_16 = arith.constant 0 : index
    %41 = vector.load %arg2[%c0_14, %40, %c0_15, %c0_16] : memref<1x20x20x128xf32, #tpu.memory_space<vmem>>, vector<1x16x16x128xf32>
    %42 = vector.shape_cast %41 : vector<1x16x16x128xf32> to vector<16x16x128xf32>
    %cst_17 = arith.constant 0.000000e+00 : f32
    %43 = vector.broadcast %cst_17 : f32 to vector<16x16x128xf32>
    %44 = arith.maximumf %42, %43 : vector<16x16x128xf32>
    %45 = vector.extract_strided_slice %1 {offsets = [1, 0, 0], sizes = [1, 1, 128], strides = [1, 1, 1]} : vector<3x3x128xf32> to vector<1x1x128xf32>
    %46 = vector.shape_cast %45 : vector<1x1x128xf32> to vector<128xf32>
    %47 = vector.shape_cast %46 : vector<128xf32> to vector<1x1x128xf32>
    %48 = vector.broadcast %47 : vector<1x1x128xf32> to vector<16x16x128xf32>
    %49 = arith.mulf %44, %48 : vector<16x16x128xf32>
    %50 = arith.addf %38, %49 : vector<16x16x128xf32>
    %c2_i32_18 = arith.constant 2 : i32
    %51 = arith.addi %0, %c2_i32_18 : i32
    %c0_19 = arith.constant 0 : index
    %52 = arith.index_cast %51 : i32 to index
    %c2_20 = arith.constant 2 : index
    %c0_21 = arith.constant 0 : index
    %53 = vector.load %arg2[%c0_19, %52, %c2_20, %c0_21] : memref<1x20x20x128xf32, #tpu.memory_space<vmem>>, vector<1x16x16x128xf32>
    %54 = vector.shape_cast %53 : vector<1x16x16x128xf32> to vector<16x16x128xf32>
    %cst_22 = arith.constant 0.000000e+00 : f32
    %55 = vector.broadcast %cst_22 : f32 to vector<16x16x128xf32>
    %56 = arith.maximumf %54, %55 : vector<16x16x128xf32>
    %57 = vector.extract_strided_slice %1 {offsets = [1, 1, 0], sizes = [1, 1, 128], strides = [1, 1, 1]} : vector<3x3x128xf32> to vector<1x1x128xf32>
    %58 = vector.shape_cast %57 : vector<1x1x128xf32> to vector<128xf32>
    %59 = vector.shape_cast %58 : vector<128xf32> to vector<1x1x128xf32>
    %60 = vector.broadcast %59 : vector<1x1x128xf32> to vector<16x16x128xf32>
    %61 = arith.mulf %56, %60 : vector<16x16x128xf32>
    %62 = arith.addf %50, %61 : vector<16x16x128xf32>
    %c2_i32_23 = arith.constant 2 : i32
    %63 = arith.addi %0, %c2_i32_23 : i32
    %c0_24 = arith.constant 0 : index
    %64 = arith.index_cast %63 : i32 to index
    %c4_25 = arith.constant 4 : index
    %c0_26 = arith.constant 0 : index
    %65 = vector.load %arg2[%c0_24, %64, %c4_25, %c0_26] : memref<1x20x20x128xf32, #tpu.memory_space<vmem>>, vector<1x16x16x128xf32>
    %66 = vector.shape_cast %65 : vector<1x16x16x128xf32> to vector<16x16x128xf32>
    %cst_27 = arith.constant 0.000000e+00 : f32
    %67 = vector.broadcast %cst_27 : f32 to vector<16x16x128xf32>
    %68 = arith.maximumf %66, %67 : vector<16x16x128xf32>
    %69 = vector.extract_strided_slice %1 {offsets = [1, 2, 0], sizes = [1, 1, 128], strides = [1, 1, 1]} : vector<3x3x128xf32> to vector<1x1x128xf32>
    %70 = vector.shape_cast %69 : vector<1x1x128xf32> to vector<128xf32>
    %71 = vector.shape_cast %70 : vector<128xf32> to vector<1x1x128xf32>
    %72 = vector.broadcast %71 : vector<1x1x128xf32> to vector<16x16x128xf32>
    %73 = arith.mulf %68, %72 : vector<16x16x128xf32>
    %74 = arith.addf %62, %73 : vector<16x16x128xf32>
    %c4_i32 = arith.constant 4 : i32
    %75 = arith.addi %0, %c4_i32 : i32
    %c0_28 = arith.constant 0 : index
    %76 = arith.index_cast %75 : i32 to index
    %c0_29 = arith.constant 0 : index
    %c0_30 = arith.constant 0 : index
    %77 = vector.load %arg2[%c0_28, %76, %c0_29, %c0_30] : memref<1x20x20x128xf32, #tpu.memory_space<vmem>>, vector<1x16x16x128xf32>
    %78 = vector.shape_cast %77 : vector<1x16x16x128xf32> to vector<16x16x128xf32>
    %cst_31 = arith.constant 0.000000e+00 : f32
    %79 = vector.broadcast %cst_31 : f32 to vector<16x16x128xf32>
    %80 = arith.maximumf %78, %79 : vector<16x16x128xf32>
    %81 = vector.extract_strided_slice %1 {offsets = [2, 0, 0], sizes = [1, 1, 128], strides = [1, 1, 1]} : vector<3x3x128xf32> to vector<1x1x128xf32>
    %82 = vector.shape_cast %81 : vector<1x1x128xf32> to vector<128xf32>
    %83 = vector.shape_cast %82 : vector<128xf32> to vector<1x1x128xf32>
    %84 = vector.broadcast %83 : vector<1x1x128xf32> to vector<16x16x128xf32>
    %85 = arith.mulf %80, %84 : vector<16x16x128xf32>
    %86 = arith.addf %74, %85 : vector<16x16x128xf32>
    %c4_i32_32 = arith.constant 4 : i32
    %87 = arith.addi %0, %c4_i32_32 : i32
    %c0_33 = arith.constant 0 : index
    %88 = arith.index_cast %87 : i32 to index
    %c2_34 = arith.constant 2 : index
    %c0_35 = arith.constant 0 : index
    %89 = vector.load %arg2[%c0_33, %88, %c2_34, %c0_35] : memref<1x20x20x128xf32, #tpu.memory_space<vmem>>, vector<1x16x16x128xf32>
    %90 = vector.shape_cast %89 : vector<1x16x16x128xf32> to vector<16x16x128xf32>
    %cst_36 = arith.constant 0.000000e+00 : f32
    %91 = vector.broadcast %cst_36 : f32 to vector<16x16x128xf32>
    %92 = arith.maximumf %90, %91 : vector<16x16x128xf32>
    %93 = vector.extract_strided_slice %1 {offsets = [2, 1, 0], sizes = [1, 1, 128], strides = [1, 1, 1]} : vector<3x3x128xf32> to vector<1x1x128xf32>
    %94 = vector.shape_cast %93 : vector<1x1x128xf32> to vector<128xf32>
    %95 = vector.shape_cast %94 : vector<128xf32> to vector<1x1x128xf32>
    %96 = vector.broadcast %95 : vector<1x1x128xf32> to vector<16x16x128xf32>
    %97 = arith.mulf %92, %96 : vector<16x16x128xf32>
    %98 = arith.addf %86, %97 : vector<16x16x128xf32>
    %c4_i32_37 = arith.constant 4 : i32
    %99 = arith.addi %0, %c4_i32_37 : i32
    %c0_38 = arith.constant 0 : index
    %100 = arith.index_cast %99 : i32 to index
    %c4_39 = arith.constant 4 : index
    %c0_40 = arith.constant 0 : index
    %101 = vector.load %arg2[%c0_38, %100, %c4_39, %c0_40] : memref<1x20x20x128xf32, #tpu.memory_space<vmem>>, vector<1x16x16x128xf32>
    %102 = vector.shape_cast %101 : vector<1x16x16x128xf32> to vector<16x16x128xf32>
    %cst_41 = arith.constant 0.000000e+00 : f32
    %103 = vector.broadcast %cst_41 : f32 to vector<16x16x128xf32>
    %104 = arith.maximumf %102, %103 : vector<16x16x128xf32>
    %105 = vector.extract_strided_slice %1 {offsets = [2, 2, 0], sizes = [1, 1, 128], strides = [1, 1, 1]} : vector<3x3x128xf32> to vector<1x1x128xf32>
    %106 = vector.shape_cast %105 : vector<1x1x128xf32> to vector<128xf32>
    %107 = vector.shape_cast %106 : vector<128xf32> to vector<1x1x128xf32>
    %108 = vector.broadcast %107 : vector<1x1x128xf32> to vector<16x16x128xf32>
    %109 = arith.mulf %104, %108 : vector<16x16x128xf32>
    %110 = arith.addf %98, %109 : vector<16x16x128xf32>
    %111 = vector.shape_cast %110 : vector<16x16x128xf32> to vector<256x128xf32>
    %112 = arith.truncf %111 : vector<256x128xf32> to vector<256x128xbf16>
    %c0_42 = arith.constant 0 : index
    %c0_43 = arith.constant 0 : index
    %113 = vector.load %arg4[%c0_42, %c0_43] : memref<128x128xbf16, #tpu.memory_space<vmem>>, vector<128x128xbf16>
    %cst_44 = arith.constant dense<0.000000e+00> : vector<256x128xf32>
    %114 = tpu.matmul %112, %113, %cst_44 {dimension_numbers = #tpu.dot_dimension_numbers<[1], [0], [0], [1], [0, 0, 1, 1], [], []>} : vector<256x128xbf16>, vector<128x128xbf16>, vector<256x128xf32> -> vector<256x128xf32>
    %cst_45 = arith.constant dense<0.000000e+00> : vector<128xf32>
    %115 = vector.multi_reduction <add>, %114, %cst_45 [0] : vector<256x128xf32> to vector<128xf32>
    %116 = vector.shape_cast %115 : vector<128xf32> to vector<1x128xf32>
    %cst_46 = arith.constant 3.906250e-03 : f32
    %117 = vector.broadcast %cst_46 : f32 to vector<1x128xf32>
    %118 = arith.mulf %116, %117 : vector<1x128xf32>
    %119 = vector.broadcast %118 : vector<1x128xf32> to vector<256x128xf32>
    %120 = arith.subf %114, %119 : vector<256x128xf32>
    %121 = arith.mulf %120, %120 : vector<256x128xf32>
    %cst_47 = arith.constant dense<0.000000e+00> : vector<128xf32>
    %122 = vector.multi_reduction <add>, %121, %cst_47 [0] : vector<256x128xf32> to vector<128xf32>
    %123 = vector.shape_cast %122 : vector<128xf32> to vector<1x128xf32>
    %124 = tpu.concatenate %116, %123 in 0 : vector<1x128xf32>, vector<1x128xf32> -> vector<2x128xf32>
    %c0_48 = arith.constant 0 : index
    %c0_49 = arith.constant 0 : index
    %c0_50 = arith.constant 0 : index
    %c0_51 = arith.constant 0 : index
    %125 = vector.load %arg6[%c0_48, %c0_49, %c0_50, %c0_51] : memref<1x1x2x128xf32, #tpu.memory_space<vmem>>, vector<1x1x2x128xf32>
    %126 = vector.shape_cast %125 : vector<1x1x2x128xf32> to vector<2x128xf32>
    %127 = vector.shape_cast %124 : vector<2x128xf32> to vector<1x1x2x128xf32>
    tpu.vector_store %arg6[%c0_48, %c0_49, %c0_50, %c0_51], %127 {strides = array<i32>} : memref<1x1x2x128xf32, #tpu.memory_space<vmem>>, vector<1x1x2x128xf32>,
    %128 = arith.truncf %114 : vector<256x128xf32> to vector<256x128xbf16>
    %c0_52 = arith.constant 0 : index
    %c0_53 = arith.constant 0 : index
    %c0_54 = arith.constant 0 : index
    %129 = vector.load %arg5[%c0_52, %c0_53, %c0_54] : memref<1x256x128xbf16, #tpu.memory_space<vmem>>, vector<1x256x128xbf16>
    %130 = vector.shape_cast %129 : vector<1x256x128xbf16> to vector<256x128xbf16>
    %131 = vector.shape_cast %128 : vector<256x128xbf16> to vector<1x256x128xbf16>
    tpu.vector_store %arg5[%c0_52, %c0_53, %c0_54], %131 {strides = array<i32>} : memref<1x256x128xbf16, #tpu.memory_space<vmem>>, vector<1x256x128xbf16>,
    return
  }
  func.func @transform_0(%arg0: i32, %arg1: i32) -> (i32, i32, i32, i32) {
    %c0_i32 = arith.constant 0 : i32
    %c0_i32_0 = arith.constant 0 : i32
    %c0_i32_1 = arith.constant 0 : i32
    %c0_i32_2 = arith.constant 0 : i32
    return %arg0, %c0_i32, %c0_i32_0, %c0_i32_1 : i32, i32, i32, i32
  }
  func.func @transform_1(%arg0: i32, %arg1: i32) -> (i32, i32, i32) {
    %c0_i32 = arith.constant 0 : i32
    %c0_i32_0 = arith.constant 0 : i32
    %c0_i32_1 = arith.constant 0 : i32
    %c0_i32_2 = arith.constant 0 : i32
    return %c0_i32, %c0_i32_0, %c0_i32_1 : i32, i32, i32
  }
  func.func @transform_2(%arg0: i32, %arg1: i32) -> (i32, i32) {
    %c0_i32 = arith.constant 0 : i32
    %c0_i32_0 = arith.constant 0 : i32
    %c0_i32_1 = arith.constant 0 : i32
    return %c0_i32, %c0_i32_0 : i32, i32
  }
  func.func @transform_3(%arg0: i32, %arg1: i32) -> (i32, i32, i32) {
    %c0_i32 = arith.constant 0 : i32
    %c0_i32_0 = arith.constant 0 : i32
    return %arg0, %arg1, %c0_i32 : i32, i32, i32
  }
  func.func @transform_4(%arg0: i32, %arg1: i32) -> (i32, i32, i32, i32) {
    %c0_i32 = arith.constant 0 : i32
    %c0_i32_0 = arith.constant 0 : i32
    %c0_i32_1 = arith.constant 0 : i32
    return %arg0, %arg1, %c0_i32, %c0_i32_0 : i32, i32, i32, i32
  }
}

</mosaic_0001>

<bundles_post_ra>
// kernel: tpu_custom_call.1
= control target key start
LH: loop header
LB: loop body
LE: loop exit
PB: predicated region body
PF: predicated region fallthrough
CT: control target
= control target key end

     0   :  { %10 = vsyncpa [#allocation3], 0  ;;  %s4170_s0 = inlined_call_operand.vmem [shape: f32[2,20,20,128], index: 0, kind: input, shape index: {}]   ;;  %s4171_s1 = inlined_call_operand.vmem [shape: f32[3,3,128], index: 1, kind: input, shape index: {}]   ;;  %s4172_s2 = inlined_call_operand.vmem [shape: bf16[128,128], index: 2, kind: input, shape index: {}]   ;;  %s4173_s3 = inlined_call_operand.hbm [shape: bf16[2,256,128], index: 3, kind: output, shape index: {0}]   ;;  %s4174_s4 = inlined_call_operand.hbm [shape: f32[2,1,2,128], index: 4, kind: output, shape index: {1}]  }
   0x1   :  { %12 = vsyncpa [#allocation3 + $0x1], 0 }
   0x2   :  { %13 = vsyncpa [#allocation5], 0 }
   0x3   :  { %15 = vsyncpa [#allocation5 + $0x1], 0  ;;  %s2794_s15 = smov 0   ;;  %s2796_s16 = smov 0  }
   0x4   :  { %s2798_s17 = smov 0   ;;  %s2800_s18 = smov 0  }
   0x5   :  { %s2802_s19 = smov 0   ;;  %s2804_s20 = smov 0  }
   0x6 LB: > { %s2119_s21 = sadd.s32 4294967295, %s2763_s20   ;;  %s2120_s22 = sadd.s32 4294967294, %s2763_s20   ;;  %s2763_s20 = sphi %s2804_s20, %s21_s20   ;;  %s2759_s19 = sphi %s2802_s19, %s4181_s19   ;;  %s2755_s18 = sphi %s2800_s18, %s4180_s18   ;;  %s2751_s17 = sphi %s2798_s17, %s4179_s17   ;;  %s2747_s16 = sphi %s2796_s16, %s4178_s16   ;;  %s2743_s15 = sphi %s2794_s15, %s4177_s15  }
   0x7   : > { %s33_s23 = sadd.s32 1, %s2759_s19  ;;  %s110_s24 = sadd.s32 1, %s2751_s17 }
   0x8   : > { %p35_p0 = scmp.ge.s32.totalorder %s33_s23, 2  ;;  %p120_p1 = scmp.ne.s32.totalorder %s2751_s17, %s2747_s16 }
   0x9   : > { %p121_p2 = scmp.eq.s32.totalorder %s2119_s21, 1  ;;  %p126_p3 = scmp.ne.s32.totalorder %s2747_s16, %s2743_s15 }
   0xa   : > { %s4183_s23 = smov (%p35_p0, %s33_s23), 0  ;;  %p127_p5 = scmp.eq.s32.totalorder %s2120_s22, 1 }
   0xb   : > { %p2834_p4 = por %p121_p2, %p120_p1  ;;  %s105_s26 = ssub.s32 %s2759_s19, %s4183_s23 }
   0xc   : > { %p2123_p6 = scmp.ge.s32.totalorder %s2763_s20, 1  ;;  %p108_p7 = scmp.eq.s32.totalorder %s105_s26, 0 }
   0xd   : > { %p2841_p8 = por %p127_p5, %p126_p3  ;;  %p187_p9 = scmp.lt.s32.totalorder %s2763_s20, 3 }
   0xe   : > { %s2847_s28 = scalar_select %p108_p7, %s2751_s17, %s110_s24  }
   0xf   : > { %p188_p10 = pnand %p2123_p6, %p187_p9 }
  0x10   : > { %v2645_v0 = vld [vmem:[%s4172_s2] sm:$0xff] (!%p188_p10)   ;;  %p218_p11 = scmp.lt.s32.totalorder (!%p188_p10), %s2755_s18, 1  ;;  %v295_v1 = vlaneseq (!%p188_p10)  ;;  %v2646_v2 = vld [vmem:[%s4172_s2 + $0x8] sm:$0xff] (!%p188_p10)   ;;  %v2647_v4 = vld [vmem:[%s4172_s2 + $0x10] sm:$0xff] (!%p188_p10)   ;;  %s2398_s24 = sshll.u32 (!%p188_p10), %s2755_s18, 11 }
  0x11   : > { %191 = sbr.rel (%p188_p10) target bundleno = 548 (0x224), region = 32  ;;  %2518 = vmatprep.subr.bf16.mxu0 (!%p188_p10), %v2645_v0  ;;  %2566 = vmatprep.subr.bf16.mxu1 (!%p188_p10), %v2645_v0  ;;  %v2648_v8 = vld [vmem:[%s4172_s2 + $0x18] sm:$0xff] (!%p188_p10)   ;;  %v226_v9 = vld [vmem:[%s4171_s1] sm:$0x7] (!%p188_p10)  ;;  %v227_v10 = vld [vmem:[%s4171_s1 + $0x4] sm:$0x7] (!%p188_p10)  ;;  %s4012_s5 = scalar_lea.hbm (!%p188_p10), %s4173_s3, %s2398_s24 }
  0x12   : > { %2519 = vmatpush3.bf16.msra.mxu0 (!%p188_p10), %v2645_v0  ;;  %2574 = vmatpush3.bf16.msra.mxu1 (!%p188_p10), %v2645_v0  ;;  %v296_v3 = vshrl.u32 (!%p188_p10), %v295_v1, 7  ;;  %v2898_v18 = vld [vmem:[%s4172_s2 + $0x20] sm:$0xff] (!%p188_p10)   ;;  %v228_v50 = vld [vmem:[%s4171_s1 + $0x8] sm:$0x7] (!%p188_p10)  ;;  %s2765_s8 = smov (!%p188_p10), [#allocation2]  }
  0x13   : > { %2520 = vmatprep.subr.bf16.mxu0 (!%p188_p10), %v2646_v2  ;;  %2567 = vmatprep.subr.bf16.mxu1 (!%p188_p10), %v2646_v2  ;;  %v2650_v57 = vld [vmem:[%s4172_s2 + $0x28] sm:$0xff] (!%p188_p10)   ;;  %s2657_s9 = sshll.u32 (!%p188_p10), %s2765_s8, 4  ;;  %s2658_s9 = int_to_ptr.vmem [resolvable:$false] %s2657_s9 }
  0x14   : > { %v2860_v5 = vsub.s32 (!%p188_p10), 0, %v296_v3  ;;  %v2867_v6 = vsub.s32 (!%p188_p10), 1, %v296_v3  ;;  %v2869_v7 = vsub.s32 (!%p188_p10), 2, %v296_v3 }
  0x16   : > { %2521 = vmatpush3.bf16.msra.mxu0 (!%p188_p10), %v2646_v2  ;;  %2575 = vmatpush3.bf16.msra.mxu1 (!%p188_p10), %v2646_v2  ;;  %v2883_v13 = vrot.slane (!%p188_p10), %v226_v9, %v2860_v5  ;;  %v2887_v15 = vrot.slane (!%p188_p10), %v226_v9, %v2867_v6  ;;  %v2890_v16 = vrot.slane (!%p188_p10), %v226_v9, %v2869_v7 }
  0x17   : > { %2522 = vmatprep.subr.bf16.mxu0 (!%p188_p10), %v2647_v4  ;;  %2568 = vmatprep.subr.bf16.mxu1 (!%p188_p10), %v2647_v4  ;;  %v2893_v17 = vrot.slane (!%p188_p10), %v227_v10, %v2860_v5  ;;  %v2904_v25 = vrot.slane (!%p188_p10), %v227_v10, %v2867_v6  ;;  %v2916_v32 = vrot.slane (!%p188_p10), %v227_v10, %v2869_v7 }
  0x18   : > { %s219_s7 = scalar_select %p218_p11, %s2755_s18, 1 }
  0x1a   : > { %s2582_s10 = smul.u32 480, %s219_s7  ;;  %2523 = vmatpush3.bf16.msra.mxu0 %v2647_v4  ;;  %2576 = vmatpush3.bf16.msra.mxu1 %v2647_v4 }
  0x1b   : > { %2524 = vmatprep.subr.bf16.mxu0 %v2648_v8  ;;  %2569 = vmatprep.subr.bf16.mxu1 %v2648_v8 }
  0x1c   : > { %s2865_s13 = scalar_lea.vmem %s4170_s0, %s2582_s10  ;;  %s2659_s10 = scalar_lea.vmem %s2658_s9, 4096 }
  0x1d   : > { %v231_v11 = vld [vmem:[%s2865_s13] sm:$0xff]  ;;  %v232_v12 = vld [vmem:[%s2865_s13 + $0x8] sm:$0xff]  ;;  %v2907_v29 = vld [vmem:[%s2865_s13 + $0x30] sm:$0xff] }
  0x1e   : > { %v363_v14 = vld [vmem:[%s2865_s13 + $0x2] sm:$0xff]  ;;  %v263_v19 = vmax.f32 %v231_v11, 0.0  ;;  %v264_v20 = vmax.f32 %v232_v12, 0.0  ;;  %v364_v21 = vld [vmem:[%s2865_s13 + $0xa] sm:$0xff]  ;;  %v2910_v30 = vld [vmem:[%s2865_s13 + $0x38] sm:$0xff]  ;;  %v662_v36 = vmax.f32 %v2907_v29, 0.0  ;;  %2525 = vmatpush3.bf16.msra.mxu0 %v2648_v8  ;;  %2577 = vmatpush3.bf16.msra.mxu1 %v2648_v8  ;;  %v2976_v8 = vrot.slane %v228_v50, %v2860_v5 }
  0x1f   : > { %v395_v22 = vmax.f32 %v363_v14, 0.0  ;;  %v495_v23 = vld [vmem:[%s2865_s13 + $0x4] sm:$0xff]  ;;  %v496_v24 = vld [vmem:[%s2865_s13 + $0xc] sm:$0xff]  ;;  %v396_v26 = vmax.f32 %v364_v21, 0.0  ;;  %v2923_v37 = vld [vmem:[%s2865_s13 + $0x3a] sm:$0xff]  ;;  %v663_v43 = vmax.f32 %v2910_v30, 0.0  ;;  %2526 = vmatprep.subr.bf16.mxu0 %v2898_v18  ;;  %2570 = vmatprep.subr.bf16.mxu1 %v2898_v18  ;;  %v2985_v14 = vrot.slane %v228_v50, %v2867_v6 }
  0x20   : > { %v527_v27 = vmax.f32 %v495_v23, 0.0  ;;  %v528_v28 = vmax.f32 %v496_v24, 0.0  ;;  %v2913_v31 = vld [vmem:[%s2865_s13 + $0x32] sm:$0xff]  ;;  %v299_v33 = vmul.f32 %v2883_v13, %v263_v19  ;;  %v300_v34 = vmul.f32 %v2883_v13, %v264_v20  ;;  %v2929_v39 = vld [vmem:[%s2865_s13 + $0x3c] sm:$0xff]  ;;  %v2224_v49 = vld [vmem:[%s2865_s13 + $0x68] sm:$0xff] }
  0x21   : > { %v431_v35 = vmul.f32 %v2887_v15, %v395_v22  ;;  %v2926_v38 = vld [vmem:[%s2865_s13 + $0x34] sm:$0xff]  ;;  %v432_v40 = vmul.f32 %v2887_v15, %v396_v26  ;;  %v2223_v44 = vld [vmem:[%s2865_s13 + $0x60] sm:$0xff]  ;;  %v698_v46 = vmul.f32 %v2893_v17, %v662_v36  ;;  %v794_v47 = vmax.f32 %v2913_v31, 0.0  ;;  %v2256_v56 = vld [vmem:[%s2865_s13 + $0x6a] sm:$0xff] }
  0x22   : > { %v563_v41 = vmul.f32 %v2890_v16, %v527_v27  ;;  %v564_v42 = vmul.f32 %v2890_v16, %v528_v28  ;;  %v795_v48 = vmax.f32 %v2923_v37, 0.0  ;;  %v699_v52 = vmul.f32 %v2893_v17, %v663_v43  ;;  %v2255_v55 = vld [vmem:[%s2865_s13 + $0x62] sm:$0xff]  ;;  %v2288_v63 = vld [vmem:[%s2865_s13 + $0x6c] sm:$0xff]  ;;  %v233_v11 = vld [vmem:[%s2865_s13 + $0x18] sm:$0xff]  ;;  %2527 = vmatpush3.bf16.msra.mxu0 %v2898_v18  ;;  %2578 = vmatpush3.bf16.msra.mxu1 %v2898_v18 }
  0x23   : > { %v463_v45 = vadd.f32 %v431_v35, %v299_v33  ;;  %v464_v51 = vadd.f32 %v432_v40, %v300_v34  ;;  %v926_v53 = vmax.f32 %v2926_v38, 0.0  ;;  %v927_v54 = vmax.f32 %v2929_v39, 0.0  ;;  %v2287_v62 = vld [vmem:[%s2865_s13 + $0x64] sm:$0xff]  ;;  %2528 = vmatprep.subr.bf16.mxu0 %v2650_v57  ;;  %v2651_v21 = vld [vmem:[%s4172_s2 + $0x30] sm:$0xff]   ;;  %v365_v26 = vld [vmem:[%s2865_s13 + $0x1a] sm:$0xff]  ;;  %2571 = vmatprep.subr.bf16.mxu1 %v2650_v57 }
  0x24   : > { %v830_v59 = vmul.f32 %v2904_v25, %v794_v47  ;;  %v831_v60 = vmul.f32 %v2904_v25, %v795_v48  ;;  %v2962_v61 = vmax.f32 %v2223_v44, 0.0  ;;  %v2973_v3 = vmax.f32 %v2224_v49, 0.0  ;;  %v234_v5 = vld [vmem:[%s2865_s13 + $0x20] sm:$0xff] }
  0x25   : > { %v595_v58 = vadd.f32 %v563_v41, %v463_v45  ;;  %v596_v0 = vadd.f32 %v564_v42, %v464_v51  ;;  %v962_v1 = vmul.f32 %v2916_v32, %v926_v53  ;;  %v963_v2 = vmul.f32 %v2916_v32, %v927_v54  ;;  %v366_v27 = vld [vmem:[%s2865_s13 + $0x22] sm:$0xff] }
  0x26   : > { %v2978_v9 = vmax.f32 %v2255_v55, 0.0  ;;  %v2980_v10 = vmax.f32 %v2256_v56, 0.0  ;;  %v2987_v19 = vmax.f32 %v2287_v62, 0.0  ;;  %v2989_v20 = vmax.f32 %v2288_v63, 0.0  ;;  %v497_v35 = vld [vmem:[%s2865_s13 + $0x1c] sm:$0xff]  ;;  %v498_v40 = vld [vmem:[%s2865_s13 + $0x24] sm:$0xff]  ;;  %2529 = vmatpush3.bf16.msra.mxu0 %v2650_v57  ;;  %2579 = vmatpush3.bf16.msra.mxu1 %v2650_v57 }
  0x27   : > { %v730_v4 = vadd.f32 %v698_v46, %v595_v58  ;;  %v731_v12 = vadd.f32 %v699_v52, %v596_v0  ;;  %v1097_v23 = vmul.f32 %v2976_v8, %v2962_v61  ;;  %v1098_v6 = vmul.f32 %v2976_v8, %v2973_v3  ;;  %v3016_v45 = vld [vmem:[%s2865_s13 + $0x48] sm:$0xff]  ;;  %v3020_v52 = vld [vmem:[%s2865_s13 + $0x50] sm:$0xff]  ;;  %2530 = vmatprep.subr.bf16.mxu0 %v2651_v21  ;;  %v2652_v55 = vld [vmem:[%s4172_s2 + $0x38] sm:$0xff]  }
  0x28   : > { %v3001_v24 = vrot.slane %v228_v50, %v2869_v7  ;;  %v1229_v18 = vmul.f32 %v2985_v14, %v2978_v9  ;;  %v1230_v33 = vmul.f32 %v2985_v14, %v2980_v10  ;;  %v265_v34 = vmax.f32 %v233_v11, 0.0  ;;  %2572 = vmatprep.subr.bf16.mxu1 %v2651_v21 }
  0x29   : > { %v862_v22 = vadd.f32 %v830_v59, %v730_v4  ;;  %v863_v28 = vadd.f32 %v831_v60, %v731_v12  ;;  %v266_v44 = vmax.f32 %v234_v5, 0.0  ;;  %v397_v50 = vmax.f32 %v365_v26, 0.0 }
  0x2a   : > { %v1361_v42 = vmul.f32 %v3001_v24, %v2987_v19  ;;  %v1362_v7 = vmul.f32 %v3001_v24, %v2989_v20  ;;  %v301_v49 = vmul.f32 %v2883_v13, %v265_v34  ;;  %v398_v51 = vmax.f32 %v366_v27, 0.0  ;;  %2531 = vmatpush3.bf16.msra.mxu0 %v2651_v21  ;;  %2580 = vmatpush3.bf16.msra.mxu1 %v2651_v21 }
  0x2b   : > { %v994_v41 = vadd.f32 %v962_v1, %v862_v22  ;;  %v995_v46 = vadd.f32 %v963_v2, %v863_v28  ;;  %v302_v58 = vmul.f32 %v2883_v13, %v266_v44  ;;  %v529_v59 = vmax.f32 %v497_v35, 0.0  ;;  %v3030_v1 = vld [vmem:[%s2865_s13 + $0x4a] sm:$0xff]  ;;  %v3033_v2 = vld [vmem:[%s2865_s13 + $0x52] sm:$0xff]  ;;  %2532 = vmatprep.subr.bf16.mxu0 %v2652_v55  ;;  %2573 = vmatprep.subr.bf16.mxu1 %v2652_v55 }
  0x2c   : > { %v530_v60 = vmax.f32 %v498_v40, 0.0  ;;  %v433_v63 = vmul.f32 %v2887_v15, %v397_v50  ;;  %v434_v0 = vmul.f32 %v2887_v15, %v398_v51  ;;  %v664_v57 = vmax.f32 %v3016_v45, 0.0  ;;  %v3039_v22 = vld [vmem:[%s2865_s13 + $0x4c] sm:$0xff]  ;;  %v3045_v28 = vld [vmem:[%s2865_s13 + $0x54] sm:$0xff]  ;;  %v2226_v50 = vld [vmem:[%s2865_s13 + $0x80] sm:$0xff] }
  0x2d   : > { %v1129_v56 = vadd.f32 %v1097_v23, %v994_v41  ;;  %v1130_v62 = vadd.f32 %v1098_v6, %v995_v46  ;;  %v565_v11 = vmul.f32 %v2890_v16, %v529_v59  ;;  %v665_v5 = vmax.f32 %v3020_v52, 0.0  ;;  %v2257_v51 = vld [vmem:[%s2865_s13 + $0x7a] sm:$0xff] }
  0x2e   : > { %v566_v12 = vmul.f32 %v2890_v16, %v530_v60  ;;  %v465_v6 = vadd.f32 %v433_v63, %v301_v49  ;;  %v466_v26 = vadd.f32 %v434_v0, %v302_v58  ;;  %v700_v27 = vmul.f32 %v2893_v17, %v664_v57  ;;  %v2289_v59 = vld [vmem:[%s2865_s13 + $0x7c] sm:$0xff]  ;;  %2533 = vmatpush3.bf16.msra.mxu0 %v2652_v55 }
  0x2f   : > { %v1261_v4 = vadd.f32 %v1229_v18, %v1129_v56  ;;  %v1262_v23 = vadd.f32 %v1230_v33, %v1130_v62  ;;  %v2225_v18 = vld [vmem:[%s2865_s13 + $0x78] sm:$0xff]  ;;  %v701_v35 = vmul.f32 %v2893_v17, %v665_v5  ;;  %v796_v33 = vmax.f32 %v3030_v1, 0.0  ;;  %2581 = vmatpush3.bf16.msra.mxu1 %v2652_v55 }
  0x30   : > { %v797_v40 = vmax.f32 %v3033_v2, 0.0  ;;  %v597_v44 = vadd.f32 %v565_v11, %v465_v6  ;;  %v598_v46 = vadd.f32 %v566_v12, %v466_v26  ;;  %v928_v49 = vmax.f32 %v3039_v22, 0.0 }
  0x31   : > { %v1393_v34 = vadd.f32 %v1361_v42, %v1261_v4  ;;  %v1394_v41 = vadd.f32 %v1362_v7, %v1262_v23  ;;  %v832_v42 = vmul.f32 %v2904_v25, %v796_v33  ;;  %v929_v58 = vmax.f32 %v3045_v28, 0.0  ;;  %v2258_v7 = vld [vmem:[%s2865_s13 + $0x82] sm:$0xff] }
  0x32   : > { %v833_v56 = vmul.f32 %v2904_v25, %v797_v40  ;;  %v3063_v21 = vmax.f32 %v2225_v18, 0.0  ;;  %v732_v62 = vadd.f32 %v700_v27, %v597_v44  ;;  %v733_v63 = vadd.f32 %v701_v35, %v598_v46  ;;  %v2290_v4 = vld [vmem:[%s2865_s13 + $0x84] sm:$0xff] }
  0x33   : > { %v1425_v60 = vpack.c.bf16 %v1394_v41, %v1393_v34  ;;  %v964_v0 = vmul.f32 %v2916_v32, %v928_v49  ;;  %v965_v11 = vmul.f32 %v2916_v32, %v929_v58  ;;  %v3074_v12 = vmax.f32 %v2226_v50, 0.0 }
  0x34   : > { %v1099_v23 = vmul.f32 %v2976_v8, %v3063_v21  ;;  %v3078_v6 = vmax.f32 %v2257_v51, 0.0  ;;  %v864_v26 = vadd.f32 %v832_v42, %v732_v62  ;;  %v865_v27 = vadd.f32 %v833_v56, %v733_v63  ;;  %v2228_v63 = vld [vmem:[%s2865_s13 + $0x98] sm:$0xff] }
  0x35   : > { %2534 = vmatprep.mubr.bf16.mxu0 %v1425_v60  ;;  %v3080_v18 = vmax.f32 %v2258_v7, 0.0  ;;  %v3082_v34 = vmax.f32 %v2289_v59, 0.0  ;;  %v1100_v35 = vmul.f32 %v2976_v8, %v3074_v12  ;;  %v3088_v44 = vmax.f32 %v2290_v4, 0.0 }
  0x36   : > { %v1231_v41 = vmul.f32 %v2985_v14, %v3078_v6  ;;  %v303_v46 = vmul.f32 %v662_v36, %v2883_v13  ;;  %v996_v55 = vadd.f32 %v964_v0, %v864_v26  ;;  %v997_v50 = vadd.f32 %v965_v11, %v865_v27 }
  0x37   : > { %v1232_v51 = vmul.f32 %v2985_v14, %v3080_v18  ;;  %v1363_v42 = vmul.f32 %v3001_v24, %v3082_v34  ;;  %v1364_v56 = vmul.f32 %v3001_v24, %v3088_v44  ;;  %v304_v7 = vmul.f32 %v663_v43, %v2883_v13 }
  0x38   : > { %v435_v29 = vmul.f32 %v794_v47, %v2887_v15  ;;  %v436_v36 = vmul.f32 %v795_v48, %v2887_v15  ;;  %v1131_v59 = vadd.f32 %v1099_v23, %v996_v55  ;;  %v1132_v60 = vadd.f32 %v1100_v35, %v997_v50  ;;  %v2227_v48 = vld [vmem:[%s2865_s13 + $0x90] sm:$0xff] }
  0x39   : > { %v567_v62 = vmul.f32 %v926_v53, %v2890_v16  ;;  %v568_v30 = vmul.f32 %v927_v54, %v2890_v16  ;;  %v702_v47 = vmul.f32 %v2962_v61, %v2893_v17  ;;  %v703_v37 = vmul.f32 %v2973_v3, %v2893_v17  ;;  %v2259_v53 = vld [vmem:[%s2865_s13 + $0x92] sm:$0xff]  ;;  %v2260_v54 = vld [vmem:[%s2865_s13 + $0x9a] sm:$0xff] }
  0x3a   : > { %v467_v43 = vadd.f32 %v435_v29, %v303_v46  ;;  %v468_v31 = vadd.f32 %v436_v36, %v304_v7  ;;  %v1263_v0 = vadd.f32 %v1231_v41, %v1131_v59  ;;  %v1264_v4 = vadd.f32 %v1232_v51, %v1132_v60  ;;  %v2291_v35 = vld [vmem:[%s2865_s13 + $0x94] sm:$0xff]  ;;  %v2292_v59 = vld [vmem:[%s2865_s13 + $0x9c] sm:$0xff] }
  0x3b   : > { %v834_v38 = vmul.f32 %v2978_v9, %v2904_v25  ;;  %v835_v39 = vmul.f32 %v2980_v10, %v2904_v25  ;;  %v966_v26 = vmul.f32 %v2987_v19, %v2916_v32  ;;  %v967_v27 = vmul.f32 %v2989_v20, %v2916_v32 }
  0x3c   : > { %v599_v11 = vadd.f32 %v567_v62, %v467_v43  ;;  %v600_v23 = vadd.f32 %v568_v30, %v468_v31  ;;  %v1395_v41 = vadd.f32 %v1363_v42, %v1263_v0  ;;  %v1396_v46 = vadd.f32 %v1364_v56, %v1264_v4 }
  0x3d   : > { %v3131_v55 = vmax.f32 %v2227_v48, 0.0  ;;  %v3133_v50 = vmax.f32 %v2228_v63, 0.0  ;;  %v3135_v29 = vmax.f32 %v2259_v53, 0.0  ;;  %v3137_v36 = vmax.f32 %v2260_v54, 0.0 }
  0x3e   : > { %v734_v51 = vadd.f32 %v702_v47, %v599_v11  ;;  %v735_v7 = vadd.f32 %v703_v37, %v600_v23  ;;  %v1426_v60 = vpack.c.bf16 %v1396_v46, %v1395_v41  ;;  %v3144_v42 = vmax.f32 %v2291_v35, 0.0  ;;  %v2230_v11 = vld [vmem:[%s2865_s13 + $0xb0] sm:$0xff] }
  0x3f   : > { %v1101_v62 = vmul.f32 %v2976_v8, %v3131_v55  ;;  %v1102_v30 = vmul.f32 %v2976_v8, %v3133_v50  ;;  %v1233_v31 = vmul.f32 %v2985_v14, %v3135_v29  ;;  %v1234_v47 = vmul.f32 %v2985_v14, %v3137_v36  ;;  %v2261_v23 = vld [vmem:[%s2865_s13 + $0xaa] sm:$0xff]  ;;  %v2262_v46 = vld [vmem:[%s2865_s13 + $0xb2] sm:$0xff] }
  0x40   : > { %v866_v56 = vadd.f32 %v834_v38, %v734_v51  ;;  %v867_v43 = vadd.f32 %v835_v39, %v735_v7  ;;  %2535 = vmatmul.mubr.bf16.vlgmr.msra.gmra.mrb[0].mxu0 %v1426_v60  ;;  %v3150_v37 = vmax.f32 %v2292_v59, 0.0  ;;  %v1365_v48 = vmul.f32 %v3001_v24, %v3144_v42 }
  0x41   : > { %v305_v63 = vmul.f32 %v664_v57, %v2883_v13  ;;  %v306_v0 = vmul.f32 %v665_v5, %v2883_v13  ;;  %v437_v39 = vmul.f32 %v796_v33, %v2887_v15  ;;  %v438_v53 = vmul.f32 %v797_v40, %v2887_v15  ;;  %v2229_v40 = vld [vmem:[%s2865_s13 + $0xa8] sm:$0xff] }
  0x42   : > { %v998_v4 = vadd.f32 %v966_v26, %v866_v56  ;;  %v999_v38 = vadd.f32 %v967_v27, %v867_v43  ;;  %v1366_v45 = vmul.f32 %v3001_v24, %v3150_v37  ;;  %v569_v57 = vmul.f32 %v928_v49, %v2890_v16 }
  0x43   : > { %v570_v52 = vmul.f32 %v929_v58, %v2890_v16  ;;  %v704_v5 = vmul.f32 %v3063_v21, %v2893_v17  ;;  %v469_v54 = vadd.f32 %v437_v39, %v305_v63  ;;  %v470_v2 = vadd.f32 %v438_v53, %v306_v0  ;;  %v2294_v0 = vld [vmem:[%s2865_s13 + $0xb4] sm:$0xff] }
  0x44   : > { %v1133_v1 = vadd.f32 %v1101_v62, %v998_v4  ;;  %v1134_v33 = vadd.f32 %v1102_v30, %v999_v38  ;;  %v705_v22 = vmul.f32 %v3074_v12, %v2893_v17  ;;  %v836_v49 = vmul.f32 %v3078_v6, %v2904_v25  ;;  %v2293_v62 = vld [vmem:[%s2865_s13 + $0xac] sm:$0xff] }
  0x45   : > { %v837_v28 = vmul.f32 %v3080_v18, %v2904_v25  ;;  %v968_v58 = vmul.f32 %v3082_v34, %v2916_v32  ;;  %v601_v35 = vadd.f32 %v569_v57, %v469_v54  ;;  %v602_v41 = vadd.f32 %v570_v52, %v470_v2 }
  0x46   : > { %v1265_v26 = vadd.f32 %v1233_v31, %v1133_v1  ;;  %v1266_v27 = vadd.f32 %v1234_v47, %v1134_v33  ;;  %v969_v51 = vmul.f32 %v3088_v44, %v2916_v32  ;;  %v3190_v7 = vmax.f32 %v2229_v40, 0.0 }
  0x47   : > { %v3192_v59 = vmax.f32 %v2230_v11, 0.0  ;;  %v3194_v60 = vmax.f32 %v2261_v23, 0.0  ;;  %v736_v43 = vadd.f32 %v704_v5, %v601_v35  ;;  %v737_v63 = vadd.f32 %v705_v22, %v602_v41  ;;  %v2263_v35 = vld [vmem:[%s2865_s13 + $0xc2] sm:$0xff] }
  0x48   : > { %v1397_v30 = vadd.f32 %v1365_v48, %v1265_v26  ;;  %v1398_v56 = vadd.f32 %v1366_v45, %v1266_v27  ;;  %v1103_v31 = vmul.f32 %v2976_v8, %v3190_v7  ;;  %v3202_v4 = vmax.f32 %v2262_v46, 0.0  ;;  %v2232_v26 = vld [vmem:[%s2865_s13 + $0xc8] sm:$0xff] }
  0x49   : > { %v1104_v47 = vmul.f32 %v2976_v8, %v3192_v59  ;;  %v1235_v38 = vmul.f32 %v2985_v14, %v3194_v60  ;;  %v868_v53 = vadd.f32 %v836_v49, %v736_v43  ;;  %v869_v57 = vadd.f32 %v837_v28, %v737_v63 }
  0x4a   : > { %v1427_v39 = vpack.c.bf16 %v1398_v56, %v1397_v30  ;;  %v3206_v52 = vmax.f32 %v2293_v62, 0.0  ;;  %v1236_v48 = vmul.f32 %v2985_v14, %v3202_v4  ;;  %v3210_v45 = vmax.f32 %v2294_v0, 0.0  ;;  %v2264_v30 = vld [vmem:[%s2865_s13 + $0xca] sm:$0xff] }
  0x4b   : > { %v307_v5 = vmul.f32 %v2962_v61, %v2883_v13  ;;  %v308_v1 = vmul.f32 %v2973_v3, %v2883_v13  ;;  %v1000_v33 = vadd.f32 %v968_v58, %v868_v53  ;;  %v1001_v54 = vadd.f32 %v969_v51, %v869_v57 }
  0x4c   : > { %2538 = vmatprep.mubr.bf16.mxu0 %v1427_v39  ;;  %v1367_v2 = vmul.f32 %v3001_v24, %v3206_v52  ;;  %v439_v40 = vmul.f32 %v2978_v9, %v2887_v15  ;;  %v1368_v11 = vmul.f32 %v3001_v24, %v3210_v45  ;;  %v440_v61 = vmul.f32 %v2980_v10, %v2887_v15  ;;  %v2231_v9 = vld [vmem:[%s2865_s13 + $0xc0] sm:$0xff] }
  0x4d   : > { %v571_v23 = vmul.f32 %v2987_v19, %v2890_v16  ;;  %v572_v3 = vmul.f32 %v2989_v20, %v2890_v16  ;;  %v1135_v22 = vadd.f32 %v1103_v31, %v1000_v33  ;;  %v1136_v49 = vadd.f32 %v1104_v47, %v1001_v54  ;;  %v2295_v31 = vld [vmem:[%s2865_s13 + $0xc4] sm:$0xff] }
  0x4e   : > { %v471_v28 = vadd.f32 %v439_v40, %v307_v5  ;;  %v706_v58 = vmul.f32 %v3131_v55, %v2893_v17  ;;  %v472_v27 = vadd.f32 %v440_v61, %v308_v1  ;;  %v707_v10 = vmul.f32 %v3133_v50, %v2893_v17 }
  0x4f   : > { %v838_v19 = vmul.f32 %v3135_v29, %v2904_v25  ;;  %v839_v20 = vmul.f32 %v3137_v36, %v2904_v25  ;;  %v1267_v41 = vadd.f32 %v1235_v38, %v1135_v22  ;;  %v1268_v46 = vadd.f32 %v1236_v48, %v1136_v49  ;;  %v2296_v38 = vld [vmem:[%s2865_s13 + $0xcc] sm:$0xff] }
  0x50   : > { %v603_v51 = vadd.f32 %v571_v23, %v471_v28  ;;  %v970_v62 = vmul.f32 %v3144_v42, %v2916_v32  ;;  %v604_v56 = vadd.f32 %v572_v3, %v472_v27  ;;  %v971_v43 = vmul.f32 %v3150_v37, %v2916_v32 }
  0x51   : > { %v3244_v63 = vmax.f32 %v2231_v9, 0.0  ;;  %v3246_v0 = vmax.f32 %v2232_v26, 0.0  ;;  %v1399_v47 = vadd.f32 %v1367_v2, %v1267_v41  ;;  %v1400_v39 = vadd.f32 %v1368_v11, %v1268_v46 }
  0x52   : > { %v738_v53 = vadd.f32 %v706_v58, %v603_v51  ;;  %v3249_v57 = vmax.f32 %v2263_v35, 0.0  ;;  %v739_v48 = vadd.f32 %v707_v10, %v604_v56  ;;  %v3256_v33 = vmax.f32 %v2264_v30, 0.0 }
  0x53   : > { %v1105_v5 = vmul.f32 %v2976_v8, %v3244_v63  ;;  %v1106_v1 = vmul.f32 %v2976_v8, %v3246_v0  ;;  %v1428_v54 = vpack.c.bf16 %v1400_v39, %v1399_v47  ;;  %v3260_v2 = vmax.f32 %v2295_v31, 0.0  ;;  %v2266_v31 = vld [vmem:[%s2865_s13 + $0xe2] sm:$0xff] }
  0x54   : > { %v870_v40 = vadd.f32 %v838_v19, %v738_v53  ;;  %v1237_v61 = vmul.f32 %v2985_v14, %v3249_v57  ;;  %v871_v11 = vadd.f32 %v839_v20, %v739_v48  ;;  %v1238_v23 = vmul.f32 %v2985_v14, %v3256_v33  ;;  %v2297_v48 = vld [vmem:[%s2865_s13 + $0xdc] sm:$0xff] }
  0x55   : > { %v3264_v3 = vmax.f32 %v2296_v38, 0.0  ;;  %v309_v22 = vmul.f32 %v3063_v21, %v2883_v13  ;;  %2539 = vmatmul.mubr.bf16.gmra.mrb[4].mxu0 %v1428_v54  ;;  %v1369_v28 = vmul.f32 %v3001_v24, %v3260_v2  ;;  %v310_v58 = vmul.f32 %v3074_v12, %v2883_v13 }
  0x56   : > { %v1002_v49 = vadd.f32 %v970_v62, %v870_v40  ;;  %v441_v9 = vmul.f32 %v3078_v6, %v2887_v15  ;;  %v1003_v26 = vadd.f32 %v971_v43, %v871_v11  ;;  %v442_v21 = vmul.f32 %v3080_v18, %v2887_v15  ;;  %v2233_v6 = vld [vmem:[%s2865_s13 + $0xd8] sm:$0xff] }
  0x57   : > { %v1370_v27 = vmul.f32 %v3001_v24, %v3264_v3  ;;  %v573_v10 = vmul.f32 %v3082_v34, %v2890_v16  ;;  %v574_v12 = vmul.f32 %v3088_v44, %v2890_v16  ;;  %v708_v35 = vmul.f32 %v3190_v7, %v2893_v17  ;;  %v2234_v34 = vld [vmem:[%s2865_s13 + $0xe0] sm:$0xff] }
  0x58   : > { %v1137_v19 = vadd.f32 %v1105_v5, %v1002_v49  ;;  %v473_v20 = vadd.f32 %v441_v9, %v309_v22  ;;  %v1138_v41 = vadd.f32 %v1106_v1, %v1003_v26  ;;  %v474_v46 = vadd.f32 %v442_v21, %v310_v58  ;;  %v2265_v62 = vld [vmem:[%s2865_s13 + $0xda] sm:$0xff] }
  0x59   : > { %v709_v51 = vmul.f32 %v3192_v59, %v2893_v17  ;;  %v840_v18 = vmul.f32 %v3194_v60, %v2904_v25  ;;  %v841_v44 = vmul.f32 %v3202_v4, %v2904_v25  ;;  %v972_v43 = vmul.f32 %v3206_v52, %v2916_v32 }
  0x5a   : > { %v1269_v30 = vadd.f32 %v1237_v61, %v1137_v19  ;;  %v605_v56 = vadd.f32 %v573_v10, %v473_v20  ;;  %v1270_v47 = vadd.f32 %v1238_v23, %v1138_v41  ;;  %v606_v39 = vadd.f32 %v574_v12, %v474_v46  ;;  %v2298_v61 = vld [vmem:[%s2865_s13 + $0xe4] sm:$0xff] }
  0x5b   : > { %v973_v53 = vmul.f32 %v3210_v45, %v2916_v32  ;;  %v3298_v38 = vmax.f32 %v2233_v6, 0.0  ;;  %v3301_v54 = vmax.f32 %v2234_v34, 0.0  ;;  %v3303_v40 = vmax.f32 %v2265_v62, 0.0 }
  0x5c   : > { %v1401_v5 = vadd.f32 %v1369_v28, %v1269_v30  ;;  %v740_v1 = vadd.f32 %v708_v35, %v605_v56  ;;  %v1402_v11 = vadd.f32 %v1370_v27, %v1270_v47  ;;  %v741_v22 = vadd.f32 %v709_v51, %v606_v39 }
  0x5d   : > { %v1107_v49 = vmul.f32 %v2976_v8, %v3298_v38  ;;  %v3308_v23 = vmax.f32 %v2266_v31, 0.0  ;;  %v1108_v9 = vmul.f32 %v2976_v8, %v3301_v54  ;;  %v1239_v28 = vmul.f32 %v2985_v14, %v3303_v40  ;;  %v2267_v31 = vld [vmem:[%s2865_s13 + $0xf2] sm:$0xff] }
  0x5e   : > { %v872_v58 = vadd.f32 %v840_v18, %v740_v1  ;;  %v3314_v26 = vmax.f32 %v2297_v48, 0.0  ;;  %v1429_v21 = vpack.c.bf16 %v1402_v11, %v1401_v5  ;;  %v873_v10 = vadd.f32 %v841_v44, %v741_v22  ;;  %v2299_v11 = vld [vmem:[%s2865_s13 + $0xf4] sm:$0xff] }
  0x5f   : > { %v1240_v27 = vmul.f32 %v2985_v14, %v3308_v23  ;;  %v3318_v19 = vmax.f32 %v2298_v61, 0.0  ;;  %v311_v35 = vmul.f32 %v3131_v55, %v2883_v13  ;;  %v312_v6 = vmul.f32 %v3133_v50, %v2883_v13 }
  0x60   : > { %v1004_v20 = vadd.f32 %v972_v43, %v872_v58  ;;  %v1371_v12 = vmul.f32 %v3001_v24, %v3314_v26  ;;  %2542 = vmatprep.mubr.bf16.mxu0 %v1429_v21  ;;  %v1005_v41 = vadd.f32 %v973_v53, %v873_v10  ;;  %v443_v51 = vmul.f32 %v3135_v29, %v2887_v15  ;;  %v2235_v43 = vld [vmem:[%s2865_s13 + $0xf0] sm:$0xff]  ;;  %v2268_v53 = vld [vmem:[%s2865_s13 + $0xfa] sm:$0xff] }
  0x61   : > { %v1372_v46 = vmul.f32 %v3001_v24, %v3318_v19  ;;  %v444_v18 = vmul.f32 %v3137_v36, %v2887_v15  ;;  %v575_v55 = vmul.f32 %v3144_v42, %v2890_v16  ;;  %v576_v50 = vmul.f32 %v3150_v37, %v2890_v16  ;;  %v2236_v36 = vld [vmem:[%s2865_s13 + $0xf8] sm:$0xff] }
  0x62   : > { %v1139_v34 = vadd.f32 %v1107_v49, %v1004_v20  ;;  %v710_v62 = vmul.f32 %v3244_v63, %v2893_v17  ;;  %v1140_v30 = vadd.f32 %v1108_v9, %v1005_v41  ;;  %v475_v56 = vadd.f32 %v443_v51, %v311_v35  ;;  %v2300_v35 = vld [vmem:[%s2865_s13 + $0xfc] sm:$0xff] }
  0x63   : > { %v476_v44 = vadd.f32 %v444_v18, %v312_v6  ;;  %v711_v29 = vmul.f32 %v3246_v0, %v2893_v17  ;;  %v842_v42 = vmul.f32 %v3249_v57, %v2904_v25  ;;  %v843_v37 = vmul.f32 %v3256_v33, %v2904_v25 }
  0x64   : > { %v1271_v47 = vadd.f32 %v1239_v28, %v1139_v34  ;;  %v974_v39 = vmul.f32 %v3260_v2, %v2916_v32  ;;  %v1272_v48 = vadd.f32 %v1240_v27, %v1140_v30  ;;  %v607_v5 = vadd.f32 %v575_v55, %v475_v56 }
  0x65   : > { %v608_v1 = vadd.f32 %v576_v50, %v476_v44  ;;  %v975_v61 = vmul.f32 %v3264_v3, %v2916_v32  ;;  %v3353_v49 = vmax.f32 %v2235_v43, 0.0  ;;  %v3355_v58 = vmax.f32 %v2236_v36, 0.0 }
  0x66   : > { %v1403_v22 = vadd.f32 %v1371_v12, %v1271_v47  ;;  %v3357_v9 = vmax.f32 %v2267_v31, 0.0  ;;  %v1404_v28 = vadd.f32 %v1372_v46, %v1272_v48  ;;  %v742_v21 = vadd.f32 %v710_v62, %v607_v5 }
  0x67   : > { %v743_v10 = vadd.f32 %v711_v29, %v608_v1  ;;  %v3359_v20 = vmax.f32 %v2268_v53, 0.0  ;;  %v1109_v27 = vmul.f32 %v2976_v8, %v3353_v49  ;;  %v1110_v6 = vmul.f32 %v2976_v8, %v3355_v58  ;;  %v2269_v53 = vld [vmem:[%s2865_s13 + $0x10a] sm:$0xff] }
  0x68   : > { %v1241_v12 = vmul.f32 %v2985_v14, %v3357_v9  ;;  %v3368_v41 = vmax.f32 %v2299_v11, 0.0  ;;  %v1430_v51 = vpack.c.bf16 %v1404_v28, %v1403_v22  ;;  %v874_v18 = vadd.f32 %v842_v42, %v742_v21  ;;  %v2270_v28 = vld [vmem:[%s2865_s13 + $0x112] sm:$0xff] }
  0x69   : > { %v875_v34 = vadd.f32 %v843_v37, %v743_v10  ;;  %v1242_v46 = vmul.f32 %v2985_v14, %v3359_v20  ;;  %v3372_v55 = vmax.f32 %v2300_v35, 0.0  ;;  %v313_v62 = vmul.f32 %v3190_v7, %v2883_v13 }
  0x6a   : > { %v1373_v50 = vmul.f32 %v3001_v24, %v3368_v41  ;;  %v314_v30 = vmul.f32 %v3192_v59, %v2883_v13  ;;  %2543 = vmatmul.mubr.bf16.gmra.mrb[8].mxu0 %v1430_v51  ;;  %v1006_v56 = vadd.f32 %v974_v39, %v874_v18  ;;  %v445_v29 = vmul.f32 %v3194_v60, %v2887_v15  ;;  %v2237_v39 = vld [vmem:[%s2865_s13 + $0x108] sm:$0xff] }
  0x6b   : > { %v1007_v44 = vadd.f32 %v975_v61, %v875_v34  ;;  %v446_v43 = vmul.f32 %v3202_v4, %v2887_v15  ;;  %v1374_v36 = vmul.f32 %v3001_v24, %v3372_v55  ;;  %v577_v7 = vmul.f32 %v3206_v52, %v2890_v16  ;;  %v2238_v4 = vld [vmem:[%s2865_s13 + $0x110] sm:$0xff] }
  0x6c   : > { %v578_v31 = vmul.f32 %v3210_v45, %v2890_v16  ;;  %v712_v59 = vmul.f32 %v3298_v38, %v2893_v17  ;;  %v1141_v47 = vadd.f32 %v1109_v27, %v1006_v56  ;;  %v477_v37 = vadd.f32 %v445_v29, %v313_v62 }
  0x6d   : > { %v1142_v42 = vadd.f32 %v1110_v6, %v1007_v44  ;;  %v478_v60 = vadd.f32 %v446_v43, %v314_v30  ;;  %v713_v48 = vmul.f32 %v3301_v54, %v2893_v17  ;;  %v844_v52 = vmul.f32 %v3303_v40, %v2904_v25  ;;  %v2301_v6 = vld [vmem:[%s2865_s13 + $0x10c] sm:$0xff]  ;;  %v2302_v30 = vld [vmem:[%s2865_s13 + $0x114] sm:$0xff] }
  0x6e   : > { %v845_v45 = vmul.f32 %v3308_v23, %v2904_v25  ;;  %v976_v5 = vmul.f32 %v3314_v26, %v2916_v32  ;;  %v1273_v1 = vadd.f32 %v1241_v12, %v1141_v47  ;;  %v609_v11 = vadd.f32 %v577_v7, %v477_v37 }
  0x6f   : > { %v1274_v61 = vadd.f32 %v1242_v46, %v1142_v42  ;;  %v610_v22 = vadd.f32 %v578_v31, %v478_v60  ;;  %v977_v21 = vmul.f32 %v3318_v19, %v2916_v32  ;;  %v3406_v10 = vmax.f32 %v2237_v39, 0.0 }
  0x70   : > { %v3408_v35 = vmax.f32 %v2238_v4, 0.0  ;;  %v3410_v27 = vmax.f32 %v2269_v53, 0.0  ;;  %v1405_v51 = vadd.f32 %v1373_v50, %v1273_v1  ;;  %v744_v34 = vadd.f32 %v712_v59, %v609_v11  ;;  %v2240_v1 = vld [vmem:[%s2865_s13 + $0x128] sm:$0xff] }
  0x71   : > { %v1406_v18 = vadd.f32 %v1374_v36, %v1274_v61  ;;  %v745_v62 = vadd.f32 %v713_v48, %v610_v22  ;;  %v1111_v12 = vmul.f32 %v2976_v8, %v3406_v10  ;;  %v3418_v56 = vmax.f32 %v2270_v28, 0.0  ;;  %v2271_v11 = vld [vmem:[%s2865_s13 + $0x122] sm:$0xff] }
  0x72   : > { %v1112_v46 = vmul.f32 %v2976_v8, %v3408_v35  ;;  %v1243_v44 = vmul.f32 %v2985_v14, %v3410_v27  ;;  %v876_v43 = vadd.f32 %v844_v52, %v744_v34  ;;  %v3422_v31 = vmax.f32 %v2301_v6, 0.0 }
  0x73   : > { %v1431_v29 = vpack.c.bf16 %v1406_v18, %v1405_v51  ;;  %v877_v7 = vadd.f32 %v845_v45, %v745_v62  ;;  %v1244_v50 = vmul.f32 %v2985_v14, %v3418_v56  ;;  %v3426_v36 = vmax.f32 %v2302_v30, 0.0  ;;  %v2272_v51 = vld [vmem:[%s2865_s13 + $0x12a] sm:$0xff] }
  0x74   : > { %v315_v59 = vmul.f32 %v3244_v63, %v2883_v13  ;;  %v316_v47 = vmul.f32 %v3246_v0, %v2883_v13  ;;  %v1008_v42 = vadd.f32 %v976_v5, %v876_v43  ;;  %v1375_v60 = vmul.f32 %v3001_v24, %v3422_v31 }
  0x75   : > { %2546 = vmatprep.mubr.bf16.mxu0 %v1431_v29  ;;  %v1009_v37 = vadd.f32 %v977_v21, %v877_v7  ;;  %v447_v39 = vmul.f32 %v3249_v57, %v2887_v15  ;;  %v1376_v4 = vmul.f32 %v3001_v24, %v3426_v36  ;;  %v448_v63 = vmul.f32 %v3256_v33, %v2887_v15  ;;  %v2239_v57 = vld [vmem:[%s2865_s13 + $0x120] sm:$0xff] }
  0x76   : > { %v579_v53 = vmul.f32 %v3260_v2, %v2890_v16  ;;  %v580_v0 = vmul.f32 %v3264_v3, %v2890_v16  ;;  %v1143_v48 = vadd.f32 %v1111_v12, %v1008_v42  ;;  %v714_v5 = vmul.f32 %v3353_v49, %v2893_v17  ;;  %v2303_v12 = vld [vmem:[%s2865_s13 + $0x124] sm:$0xff] }
  0x77   : > { %v1144_v52 = vadd.f32 %v1112_v46, %v1009_v37  ;;  %v479_v45 = vadd.f32 %v447_v39, %v315_v59  ;;  %v480_v61 = vadd.f32 %v448_v63, %v316_v47  ;;  %v715_v33 = vmul.f32 %v3355_v58, %v2893_v17 }
  0x78   : > { %v846_v2 = vmul.f32 %v3357_v9, %v2904_v25  ;;  %v847_v3 = vmul.f32 %v3359_v20, %v2904_v25  ;;  %v1275_v22 = vadd.f32 %v1243_v44, %v1143_v48  ;;  %v978_v6 = vmul.f32 %v3368_v41, %v2916_v32  ;;  %v2304_v44 = vld [vmem:[%s2865_s13 + $0x12c] sm:$0xff] }
  0x79   : > { %v1276_v28 = vadd.f32 %v1244_v50, %v1144_v52  ;;  %v611_v21 = vadd.f32 %v579_v53, %v479_v45  ;;  %v612_v18 = vadd.f32 %v580_v0, %v480_v61  ;;  %v979_v34 = vmul.f32 %v3372_v55, %v2916_v32 }
  0x7a   : > { %v3460_v62 = vmax.f32 %v2239_v57, 0.0  ;;  %v3462_v30 = vmax.f32 %v2240_v1, 0.0  ;;  %v1407_v46 = vadd.f32 %v1375_v60, %v1275_v22  ;;  %v3465_v7 = vmax.f32 %v2271_v11, 0.0 }
  0x7b   : > { %v1408_v29 = vadd.f32 %v1376_v4, %v1276_v28  ;;  %v746_v43 = vadd.f32 %v714_v5, %v611_v21  ;;  %v747_v50 = vadd.f32 %v715_v33, %v612_v18  ;;  %v3472_v42 = vmax.f32 %v2272_v51, 0.0 }
  0x7c   : > { %v1113_v59 = vmul.f32 %v2976_v8, %v3460_v62  ;;  %v1114_v47 = vmul.f32 %v2976_v8, %v3462_v30  ;;  %v1245_v63 = vmul.f32 %v2985_v14, %v3465_v7  ;;  %v3476_v60 = vmax.f32 %v2303_v12, 0.0  ;;  %v2274_v12 = vld [vmem:[%s2865_s13 + $0x142] sm:$0xff] }
  0x7d   : > { %v1432_v37 = vpack.c.bf16 %v1408_v29, %v1407_v46  ;;  %v878_v39 = vadd.f32 %v846_v2, %v746_v43  ;;  %v879_v4 = vadd.f32 %v847_v3, %v747_v50  ;;  %v1246_v53 = vmul.f32 %v2985_v14, %v3472_v42  ;;  %v2305_v50 = vld [vmem:[%s2865_s13 + $0x13c] sm:$0xff] }
  0x7e   : > { %v3480_v0 = vmax.f32 %v2304_v44, 0.0  ;;  %v317_v48 = vmul.f32 %v3298_v38, %v2883_v13  ;;  %v1377_v45 = vmul.f32 %v3001_v24, %v3476_v60  ;;  %v318_v5 = vmul.f32 %v3301_v54, %v2883_v13 }
  0x7f   : > { %2547 = vmatmul.mubr.bf16.gmra.mrb[12].mxu0 %v1432_v37  ;;  %v1010_v52 = vadd.f32 %v978_v6, %v878_v39  ;;  %v449_v57 = vmul.f32 %v3303_v40, %v2887_v15  ;;  %v1011_v1 = vadd.f32 %v979_v34, %v879_v4  ;;  %v450_v38 = vmul.f32 %v3308_v23, %v2887_v15  ;;  %v2241_v40 = vld [vmem:[%s2865_s13 + $0x138] sm:$0xff] }
  0x80   : > { %v1378_v61 = vmul.f32 %v3001_v24, %v3480_v0  ;;  %v581_v33 = vmul.f32 %v3314_v26, %v2890_v16  ;;  %v582_v54 = vmul.f32 %v3318_v19, %v2890_v16  ;;  %v716_v11 = vmul.f32 %v3406_v10, %v2893_v17  ;;  %v2242_v26 = vld [vmem:[%s2865_s13 + $0x140] sm:$0xff] }
  0x81   : > { %v1145_v2 = vadd.f32 %v1113_v59, %v1010_v52  ;;  %v481_v3 = vadd.f32 %v449_v57, %v317_v48  ;;  %v1146_v22 = vadd.f32 %v1114_v47, %v1011_v1  ;;  %v482_v28 = vadd.f32 %v450_v38, %v318_v5  ;;  %v2273_v6 = vld [vmem:[%s2865_s13 + $0x13a] sm:$0xff] }
  0x82   : > { %v717_v21 = vmul.f32 %v3408_v35, %v2893_v17  ;;  %v848_v23 = vmul.f32 %v3410_v27, %v2904_v25  ;;  %v849_v19 = vmul.f32 %v3418_v56, %v2904_v25  ;;  %v980_v34 = vmul.f32 %v3422_v31, %v2916_v32 }
  0x83   : > { %v1277_v51 = vadd.f32 %v1245_v63, %v1145_v2  ;;  %v613_v18 = vadd.f32 %v581_v33, %v481_v3  ;;  %v1278_v46 = vadd.f32 %v1246_v53, %v1146_v22  ;;  %v614_v29 = vadd.f32 %v582_v54, %v482_v28  ;;  %v2306_v63 = vld [vmem:[%s2865_s13 + $0x144] sm:$0xff] }
  0x84   : > { %v981_v43 = vmul.f32 %v3426_v36, %v2916_v32  ;;  %v3514_v44 = vmax.f32 %v2241_v40, 0.0  ;;  %v3517_v37 = vmax.f32 %v2242_v26, 0.0  ;;  %v3519_v39 = vmax.f32 %v2273_v6, 0.0 }
  0x85   : > { %v1409_v59 = vadd.f32 %v1377_v45, %v1277_v51  ;;  %v748_v47 = vadd.f32 %v716_v11, %v613_v18  ;;  %v1410_v4 = vadd.f32 %v1378_v61, %v1278_v46  ;;  %v749_v48 = vadd.f32 %v717_v21, %v614_v29 }
  0x86   : > { %v1115_v52 = vmul.f32 %v2976_v8, %v3514_v44  ;;  %v3524_v53 = vmax.f32 %v2274_v12, 0.0  ;;  %v1116_v57 = vmul.f32 %v2976_v8, %v3517_v37  ;;  %v1247_v45 = vmul.f32 %v2985_v14, %v3519_v39  ;;  %v2275_v12 = vld [vmem:[%s2865_s13 + $0x152] sm:$0xff] }
  0x87   : > { %v880_v5 = vadd.f32 %v848_v23, %v748_v47  ;;  %v3530_v1 = vmax.f32 %v2305_v50, 0.0  ;;  %v1433_v38 = vpack.c.bf16 %v1410_v4, %v1409_v59  ;;  %v881_v33 = vadd.f32 %v849_v19, %v749_v48  ;;  %v2307_v4 = vld [vmem:[%s2865_s13 + $0x154] sm:$0xff] }
  0x88   : > { %v1248_v61 = vmul.f32 %v2985_v14, %v3524_v53  ;;  %v3534_v2 = vmax.f32 %v2306_v63, 0.0  ;;  %v319_v11 = vmul.f32 %v3353_v49, %v2883_v13  ;;  %v320_v40 = vmul.f32 %v3355_v58, %v2883_v13 }
  0x89   : > { %v1012_v3 = vadd.f32 %v980_v34, %v880_v5  ;;  %v1379_v54 = vmul.f32 %v3001_v24, %v3530_v1  ;;  %2550 = vmatprep.mubr.bf16.mxu1 %v1433_v38  ;;  %v1013_v22 = vadd.f32 %v981_v43, %v881_v33  ;;  %v451_v21 = vmul.f32 %v3357_v9, %v2887_v15  ;;  %v2243_v34 = vld [vmem:[%s2865_s13 + $0x150] sm:$0xff]  ;;  %v2276_v43 = vld [vmem:[%s2865_s13 + $0x15a] sm:$0xff] }
  0x8a   : > { %v1380_v28 = vmul.f32 %v3001_v24, %v3534_v2  ;;  %v452_v23 = vmul.f32 %v3359_v20, %v2887_v15  ;;  %v583_v49 = vmul.f32 %v3368_v41, %v2890_v16  ;;  %v584_v58 = vmul.f32 %v3372_v55, %v2890_v16  ;;  %v2244_v20 = vld [vmem:[%s2865_s13 + $0x158] sm:$0xff] }
  0x8b   : > { %v1147_v26 = vadd.f32 %v1115_v52, %v1012_v3  ;;  %v718_v6 = vmul.f32 %v3460_v62, %v2893_v17  ;;  %v1148_v51 = vadd.f32 %v1116_v57, %v1013_v22  ;;  %v483_v18 = vadd.f32 %v451_v21, %v319_v11  ;;  %v2308_v11 = vld [vmem:[%s2865_s13 + $0x15c] sm:$0xff] }
  0x8c   : > { %v484_v19 = vadd.f32 %v452_v23, %v320_v40  ;;  %v719_v9 = vmul.f32 %v3462_v30, %v2893_v17  ;;  %v850_v41 = vmul.f32 %v3465_v7, %v2904_v25  ;;  %v851_v55 = vmul.f32 %v3472_v42, %v2904_v25 }
  0x8d   : > { %v1279_v46 = vadd.f32 %v1247_v45, %v1147_v26  ;;  %v982_v29 = vmul.f32 %v3476_v60, %v2916_v32  ;;  %v1280_v50 = vadd.f32 %v1248_v61, %v1148_v51  ;;  %v615_v59 = vadd.f32 %v583_v49, %v483_v18 }
  0x8e   : > { %v616_v47 = vadd.f32 %v584_v58, %v484_v19  ;;  %v983_v63 = vmul.f32 %v3480_v0, %v2916_v32  ;;  %v3569_v52 = vmax.f32 %v2243_v34, 0.0  ;;  %v3571_v5 = vmax.f32 %v2244_v20, 0.0 }
  0x8f   : > { %v1411_v48 = vadd.f32 %v1379_v54, %v1279_v46  ;;  %v3573_v57 = vmax.f32 %v2275_v12, 0.0  ;;  %v1412_v45 = vadd.f32 %v1380_v28, %v1280_v50  ;;  %v750_v38 = vadd.f32 %v718_v6, %v615_v59 }
  0x90   : > { %v751_v33 = vadd.f32 %v719_v9, %v616_v47  ;;  %v3575_v3 = vmax.f32 %v2276_v43, 0.0  ;;  %v1117_v61 = vmul.f32 %v2976_v8, %v3569_v52  ;;  %v1118_v40 = vmul.f32 %v2976_v8, %v3571_v5  ;;  %v2277_v43 = vld [vmem:[%s2865_s13 + $0x16a] sm:$0xff] }
  0x91   : > { %v1249_v54 = vmul.f32 %v2985_v14, %v3573_v57  ;;  %v3584_v22 = vmax.f32 %v2307_v4, 0.0  ;;  %v1434_v21 = vpack.c.bf16 %v1412_v45, %v1411_v48  ;;  %v882_v23 = vadd.f32 %v850_v41, %v750_v38  ;;  %v2278_v45 = vld [vmem:[%s2865_s13 + $0x172] sm:$0xff] }
  0x92   : > { %v883_v26 = vadd.f32 %v851_v55, %v751_v33  ;;  %v1250_v28 = vmul.f32 %v2985_v14, %v3575_v3  ;;  %v3588_v49 = vmax.f32 %v2308_v11, 0.0  ;;  %v321_v6 = vmul.f32 %v3406_v10, %v2883_v13 }
  0x93   : > { %v1381_v58 = vmul.f32 %v3001_v24, %v3584_v22  ;;  %v322_v51 = vmul.f32 %v3408_v35, %v2883_v13  ;;  %2551 = vmatmul.mubr.bf16.vlgmr.msra.gmra.mrb[0].mxu1 %v1434_v21  ;;  %v1014_v18 = vadd.f32 %v982_v29, %v882_v23  ;;  %v453_v9 = vmul.f32 %v3410_v27, %v2887_v15  ;;  %v2245_v29 = vld [vmem:[%s2865_s13 + $0x168] sm:$0xff] }
  0x94   : > { %v1015_v19 = vadd.f32 %v983_v63, %v883_v26  ;;  %v454_v34 = vmul.f32 %v3418_v56, %v2887_v15  ;;  %v1382_v20 = vmul.f32 %v3001_v24, %v3588_v49  ;;  %v585_v10 = vmul.f32 %v3422_v31, %v2890_v16  ;;  %v2246_v56 = vld [vmem:[%s2865_s13 + $0x170] sm:$0xff] }
  0x95   : > { %v586_v12 = vmul.f32 %v3426_v36, %v2890_v16  ;;  %v720_v35 = vmul.f32 %v3514_v44, %v2893_v17  ;;  %v1149_v46 = vadd.f32 %v1117_v61, %v1014_v18  ;;  %v485_v55 = vadd.f32 %v453_v9, %v321_v6 }
  0x96   : > { %v1150_v41 = vadd.f32 %v1118_v40, %v1015_v19  ;;  %v486_v27 = vadd.f32 %v454_v34, %v322_v51  ;;  %v721_v50 = vmul.f32 %v3517_v37, %v2893_v17  ;;  %v852_v31 = vmul.f32 %v3519_v39, %v2904_v25  ;;  %v2309_v40 = vld [vmem:[%s2865_s13 + $0x16c] sm:$0xff]  ;;  %v2310_v51 = vld [vmem:[%s2865_s13 + $0x174] sm:$0xff] }
  0x97   : > { %v853_v36 = vmul.f32 %v3524_v53, %v2904_v25  ;;  %v984_v59 = vmul.f32 %v3530_v1, %v2916_v32  ;;  %v1281_v47 = vadd.f32 %v1249_v54, %v1149_v46  ;;  %v617_v4 = vadd.f32 %v585_v10, %v485_v55 }
  0x98   : > { %v1282_v63 = vadd.f32 %v1250_v28, %v1150_v41  ;;  %v618_v48 = vadd.f32 %v586_v12, %v486_v27  ;;  %v985_v38 = vmul.f32 %v3534_v2, %v2916_v32  ;;  %v3622_v33 = vmax.f32 %v2245_v29, 0.0 }
  0x99   : > { %v3624_v11 = vmax.f32 %v2246_v56, 0.0  ;;  %v3626_v61 = vmax.f32 %v2277_v43, 0.0  ;;  %v1413_v21 = vadd.f32 %v1381_v58, %v1281_v47  ;;  %v752_v26 = vadd.f32 %v720_v35, %v617_v4  ;;  %v3666_v47 = vld [vmem:[%s2865_s13 + $0x188] sm:$0xff] }
  0x9a   : > { %v1414_v23 = vadd.f32 %v1382_v20, %v1282_v63  ;;  %v753_v6 = vadd.f32 %v721_v50, %v618_v48  ;;  %v1119_v54 = vmul.f32 %v2976_v8, %v3622_v33  ;;  %v3634_v18 = vmax.f32 %v2278_v45, 0.0  ;;  %v3675_v4 = vld [vmem:[%s2865_s13 + $0x182] sm:$0xff] }
  0x9b   : > { %v1120_v28 = vmul.f32 %v2976_v8, %v3624_v11  ;;  %v1251_v19 = vmul.f32 %v2985_v14, %v3626_v61  ;;  %v884_v34 = vadd.f32 %v852_v31, %v752_v26  ;;  %v3638_v12 = vmax.f32 %v2309_v40, 0.0 }
  0x9c   : > { %v1435_v9 = vpack.c.bf16 %v1414_v23, %v1413_v21  ;;  %v885_v10 = vadd.f32 %v853_v36, %v753_v6  ;;  %v1252_v58 = vmul.f32 %v2985_v14, %v3634_v18  ;;  %v3642_v20 = vmax.f32 %v2310_v51, 0.0  ;;  %v3680_v21 = vld [vmem:[%s2865_s13 + $0x18a] sm:$0xff] }
  0x9d   : > { %v323_v35 = vmul.f32 %v3460_v62, %v2883_v13  ;;  %v324_v46 = vmul.f32 %v3462_v30, %v2883_v13  ;;  %v1016_v41 = vadd.f32 %v984_v59, %v884_v34  ;;  %v1383_v27 = vmul.f32 %v3001_v24, %v3638_v12 }
  0x9e   : > { %2554 = vmatprep.mubr.bf16.mxu1 %v1435_v9  ;;  %v1017_v55 = vadd.f32 %v985_v38, %v885_v10  ;;  %v455_v29 = vmul.f32 %v3465_v7, %v2887_v15  ;;  %v1384_v56 = vmul.f32 %v3001_v24, %v3642_v20  ;;  %v456_v62 = vmul.f32 %v3472_v42, %v2887_v15  ;;  %v3663_v7 = vld [vmem:[%s2865_s13 + $0x180] sm:$0xff]  ;;  %v3691_v10 = vld [vmem:[%s2865_s13 + $0x18c] sm:$0xff] }
  0x9f   : > { %v587_v43 = vmul.f32 %v3476_v60, %v2890_v16  ;;  %v588_v30 = vmul.f32 %v3480_v0, %v2890_v16  ;;  %v1151_v50 = vadd.f32 %v1119_v54, %v1016_v41  ;;  %v722_v59 = vmul.f32 %v3569_v52, %v2893_v17  ;;  %v3687_v54 = vld [vmem:[%s2865_s13 + $0x184] sm:$0xff] }
  0xa0   : > { %v1152_v31 = vadd.f32 %v1120_v28, %v1017_v55  ;;  %v487_v36 = vadd.f32 %v455_v29, %v323_v35  ;;  %v488_v63 = vadd.f32 %v456_v62, %v324_v46  ;;  %v723_v42 = vmul.f32 %v3571_v5, %v2893_v17 }
  0xa1   : > { %v854_v60 = vmul.f32 %v3573_v57, %v2904_v25  ;;  %v855_v0 = vmul.f32 %v3575_v3, %v2904_v25  ;;  %v1283_v48 = vadd.f32 %v1251_v19, %v1151_v50  ;;  %v986_v40 = vmul.f32 %v3584_v22, %v2916_v32 }
  0xa2   : > { %v1284_v45 = vadd.f32 %v1252_v58, %v1152_v31  ;;  %v619_v38 = vadd.f32 %v587_v43, %v487_v36  ;;  %v620_v23 = vadd.f32 %v588_v30, %v488_v63  ;;  %v987_v26 = vmul.f32 %v3588_v49, %v2916_v32 }
  0xa3   : > { %v1085_v6 = vmax.f32 %v3663_v7, 0.0  ;;  %v1086_v51 = vmax.f32 %v3666_v47, 0.0  ;;  %v1415_v28 = vadd.f32 %v1383_v27, %v1283_v48  ;;  %v1217_v34 = vmax.f32 %v3675_v4, 0.0 }
  0xa4   : > { %v1416_v9 = vadd.f32 %v1384_v56, %v1284_v45  ;;  %v754_v19 = vadd.f32 %v722_v59, %v619_v38  ;;  %v755_v58 = vadd.f32 %v723_v42, %v620_v23  ;;  %v1218_v41 = vmax.f32 %v3680_v21, 0.0  ;;  %v3729_v38 = vld [vmem:[%s2865_s13 + $0x198] sm:$0xff] }
  0xa5   : > { %v1121_v35 = vmul.f32 %v2976_v8, %v1085_v6  ;;  %v1122_v46 = vmul.f32 %v2976_v8, %v1086_v51  ;;  %v1253_v27 = vmul.f32 %v2985_v14, %v1217_v34  ;;  %v1349_v56 = vmax.f32 %v3687_v54, 0.0  ;;  %v2316_v54 = vld [vmem:[%s2865_s13 + $0x1bc] sm:$0xff] }
  0xa6   : > { %v1436_v55 = vpack.c.bf16 %v1416_v9, %v1415_v28  ;;  %v886_v29 = vadd.f32 %v854_v60, %v754_v19  ;;  %v887_v62 = vadd.f32 %v855_v0, %v755_v58  ;;  %v1254_v43 = vmul.f32 %v2985_v14, %v1218_v41  ;;  %v3739_v28 = vld [vmem:[%s2865_s13 + $0x19a] sm:$0xff] }
  0xa7   : > { %v1350_v30 = vmax.f32 %v3691_v10, 0.0  ;;  %v325_v50 = vmul.f32 %v3514_v44, %v2883_v13  ;;  %v1385_v36 = vmul.f32 %v3001_v24, %v1349_v56  ;;  %v326_v59 = vmul.f32 %v3517_v37, %v2883_v13 }
  0xa8   : > { %2555 = vmatmul.mubr.bf16.gmra.mrb[4].mxu1 %v1436_v55  ;;  %v1018_v31 = vadd.f32 %v986_v40, %v886_v29  ;;  %v457_v63 = vmul.f32 %v3519_v39, %v2887_v15  ;;  %v1019_v42 = vadd.f32 %v987_v26, %v887_v62  ;;  %v458_v44 = vmul.f32 %v3524_v53, %v2887_v15  ;;  %v3736_v26 = vld [vmem:[%s2865_s13 + $0x1a0] sm:$0xff] }
  0xa9   : > { %v1386_v60 = vmul.f32 %v3001_v24, %v1350_v30  ;;  %v589_v0 = vmul.f32 %v3530_v1, %v2890_v16  ;;  %v590_v37 = vmul.f32 %v3534_v2, %v2890_v16  ;;  %v724_v39 = vmul.f32 %v3622_v33, %v2893_v17 }
  0xaa   : > { %v1153_v48 = vadd.f32 %v1121_v35, %v1018_v31  ;;  %v489_v45 = vadd.f32 %v457_v63, %v325_v50  ;;  %v1154_v40 = vadd.f32 %v1122_v46, %v1019_v42  ;;  %v490_v23 = vadd.f32 %v458_v44, %v326_v59  ;;  %v3746_v35 = vld [vmem:[%s2865_s13 + $0x1a2] sm:$0xff] }
  0xab   : > { %v725_v53 = vmul.f32 %v3624_v11, %v2893_v17  ;;  %v856_v1 = vmul.f32 %v3626_v61, %v2904_v25  ;;  %v857_v19 = vmul.f32 %v3634_v18, %v2904_v25  ;;  %v988_v58 = vmul.f32 %v3638_v12, %v2916_v32  ;;  %v3752_v50 = vld [vmem:[%s2865_s13 + $0x19c] sm:$0xff]  ;;  %v3757_v42 = vld [vmem:[%s2865_s13 + $0x1a4] sm:$0xff] }
  0xac   : > { %v1285_v2 = vadd.f32 %v1253_v27, %v1153_v48  ;;  %v621_v9 = vadd.f32 %v589_v0, %v489_v45  ;;  %v1286_v46 = vadd.f32 %v1254_v43, %v1154_v40  ;;  %v622_v55 = vadd.f32 %v590_v37, %v490_v23 }
  0xad   : > { %v989_v29 = vmul.f32 %v3642_v20, %v2916_v32  ;;  %v1087_v62 = vmax.f32 %v3729_v38, 0.0  ;;  %v1088_v59 = vmax.f32 %v3736_v26, 0.0  ;;  %v1219_v63 = vmax.f32 %v3739_v28, 0.0 }
  0xae   : > { %v1417_v31 = vadd.f32 %v1385_v36, %v1285_v2  ;;  %v756_v27 = vadd.f32 %v724_v39, %v621_v9  ;;  %v1418_v44 = vadd.f32 %v1386_v60, %v1286_v46  ;;  %v757_v0 = vadd.f32 %v725_v53, %v622_v55 }
  0xaf   : > { %v1123_v43 = vmul.f32 %v2976_v8, %v1087_v62  ;;  %v1220_v48 = vmax.f32 %v3746_v35, 0.0  ;;  %v1124_v36 = vmul.f32 %v2976_v8, %v1088_v59  ;;  %v1255_v37 = vmul.f32 %v2985_v14, %v1219_v63 }
  0xb0   : > { %v888_v45 = vadd.f32 %v856_v1, %v756_v27  ;;  %v1351_v39 = vmax.f32 %v3752_v50, 0.0  ;;  %v1437_v40 = vpack.c.bf16 %v1418_v44, %v1417_v31  ;;  %v889_v60 = vadd.f32 %v857_v19, %v757_v0  ;;  %v2318_v50 = vld [vmem:[%s2865_s13 + $0x1d4] sm:$0xff] }
  0xb1   : > { %v1256_v23 = vmul.f32 %v2985_v14, %v1220_v48  ;;  %v1352_v53 = vmax.f32 %v3757_v42, 0.0  ;;  %v327_v9 = vmul.f32 %v3569_v52, %v2883_v13  ;;  %v328_v46 = vmul.f32 %v3571_v5, %v2883_v13 }
  0xb2   : > { %v1020_v2 = vadd.f32 %v988_v58, %v888_v45  ;;  %v1387_v1 = vmul.f32 %v3001_v24, %v1351_v39  ;;  %2558 = vmatprep.mubr.bf16.mxu1 %v1437_v40  ;;  %v1021_v19 = vadd.f32 %v989_v29, %v889_v60  ;;  %v459_v58 = vmul.f32 %v3573_v57, %v2887_v15  ;;  %v2283_v40 = vld [vmem:[%s2865_s13 + $0x1b2] sm:$0xff] }
  0xb3   : > { %v1388_v55 = vmul.f32 %v3001_v24, %v1352_v53  ;;  %v460_v31 = vmul.f32 %v3575_v3, %v2887_v15  ;;  %v591_v52 = vmul.f32 %v3584_v22, %v2890_v16  ;;  %v592_v5 = vmul.f32 %v3588_v49, %v2890_v16  ;;  %v2251_v3 = vld [vmem:[%s2865_s13 + $0x1b0] sm:$0xff] }
  0xb4   : > { %v1155_v27 = vadd.f32 %v1123_v43, %v1020_v2  ;;  %v726_v29 = vmul.f32 %v1085_v6, %v2893_v17  ;;  %v1156_v44 = vadd.f32 %v1124_v36, %v1021_v19  ;;  %v491_v0 = vadd.f32 %v459_v58, %v327_v9  ;;  %v2252_v43 = vld [vmem:[%s2865_s13 + $0x1b8] sm:$0xff] }
  0xb5   : > { %v492_v45 = vadd.f32 %v460_v31, %v328_v46  ;;  %v727_v57 = vmul.f32 %v1086_v51, %v2893_v17  ;;  %v858_v22 = vmul.f32 %v1217_v34, %v2904_v25  ;;  %v859_v49 = vmul.f32 %v1218_v41, %v2904_v25  ;;  %v2284_v6 = vld [vmem:[%s2865_s13 + $0x1ba] sm:$0xff] }
  0xb6   : > { %v1287_v60 = vadd.f32 %v1255_v37, %v1155_v27  ;;  %v990_v7 = vmul.f32 %v1349_v56, %v2916_v32  ;;  %v1288_v47 = vadd.f32 %v1256_v23, %v1156_v44  ;;  %v623_v51 = vadd.f32 %v591_v52, %v491_v0  ;;  %v2315_v2 = vld [vmem:[%s2865_s13 + $0x1b4] sm:$0xff] }
  0xb7   : > { %v624_v36 = vadd.f32 %v592_v5, %v492_v45  ;;  %v991_v37 = vmul.f32 %v1350_v30, %v2916_v32  ;;  %v1089_v34 = vmax.f32 %v2251_v3, 0.0  ;;  %v1090_v9 = vmax.f32 %v2252_v43, 0.0 }
  0xb8   : > { %v1419_v4 = vadd.f32 %v1387_v1, %v1287_v60  ;;  %v1221_v46 = vmax.f32 %v2283_v40, 0.0  ;;  %v1420_v21 = vadd.f32 %v1388_v55, %v1288_v47  ;;  %v758_v41 = vadd.f32 %v726_v29, %v623_v51  ;;  %v2286_v51 = vld [vmem:[%s2865_s13 + $0x1d2] sm:$0xff] }
  0xb9   : > { %v759_v19 = vadd.f32 %v727_v57, %v624_v36  ;;  %v1222_v58 = vmax.f32 %v2284_v6, 0.0  ;;  %v1125_v56 = vmul.f32 %v2976_v8, %v1089_v34  ;;  %v1126_v23 = vmul.f32 %v2976_v8, %v1090_v9 }
  0xba   : > { %v1257_v31 = vmul.f32 %v2985_v14, %v1221_v46  ;;  %v1353_v27 = vmax.f32 %v2315_v2, 0.0  ;;  %v1438_v52 = vpack.c.bf16 %v1420_v21, %v1419_v4  ;;  %v890_v10 = vadd.f32 %v858_v22, %v758_v41 }
  0xbb   : > { %v891_v30 = vadd.f32 %v859_v49, %v759_v19  ;;  %v1258_v1 = vmul.f32 %v2985_v14, %v1222_v58  ;;  %v1354_v5 = vmax.f32 %v2316_v54, 0.0  ;;  %v329_v55 = vmul.f32 %v3622_v33, %v2883_v13  ;;  %v2253_v49 = vld [vmem:[%s2865_s13 + $0x1c8] sm:$0xff] }
  0xbc   : > { %v1389_v44 = vmul.f32 %v3001_v24, %v1353_v27  ;;  %v330_v29 = vmul.f32 %v3624_v11, %v2883_v13  ;;  %2559 = vmatmul.mubr.bf16.gmra.mrb[8].mxu1 %v1438_v52  ;;  %v1022_v0 = vadd.f32 %v990_v7, %v890_v10  ;;  %v461_v57 = vmul.f32 %v3626_v61, %v2887_v15 }
  0xbd   : > { %v1023_v45 = vadd.f32 %v991_v37, %v891_v30  ;;  %v462_v3 = vmul.f32 %v3634_v18, %v2887_v15  ;;  %v1390_v43 = vmul.f32 %v3001_v24, %v1354_v5  ;;  %v593_v40 = vmul.f32 %v3638_v12, %v2890_v16  ;;  %v2254_v15 = vld [vmem:[%s2865_s13 + $0x1d0] sm:$0xff] }
  0xbe   : > { %v594_v33 = vmul.f32 %v3642_v20, %v2890_v16  ;;  %v728_v13 = vmul.f32 %v1087_v62, %v2893_v17  ;;  %v1157_v11 = vadd.f32 %v1125_v56, %v1022_v0  ;;  %v493_v22 = vadd.f32 %v461_v57, %v329_v55  ;;  %v2285_v18 = vld [vmem:[%s2865_s13 + $0x1ca] sm:$0xff] }
  0xbf   : > { %v1158_v60 = vadd.f32 %v1126_v23, %v1023_v45  ;;  %v494_v61 = vadd.f32 %v462_v3, %v330_v29  ;;  %v729_v12 = vmul.f32 %v1088_v59, %v2893_v17  ;;  %v860_v16 = vmul.f32 %v1219_v63, %v2904_v25  ;;  %v2317_v63 = vld [vmem:[%s2865_s13 + $0x1cc] sm:$0xff]  ;;  %s3865_s13 = sand.u32 1, %s2747_s16  }
  0xc0   : > { %v861_v20 = vmul.f32 %v1220_v48, %v2904_v25  ;;  %v992_v38 = vmul.f32 %v1351_v39, %v2916_v32  ;;  %v1289_v62 = vadd.f32 %v1257_v31, %v1157_v11  ;;  %v625_v6 = vadd.f32 %v593_v40, %v493_v22  ;;  %s2124_s21 = sshll.u32 %s3865_s13, 7  ;;  %s1969_s6 = scalar_lea.sflag [#allocation3], %s3865_s13 }
  0xc1   : > { %v1290_v7 = vadd.f32 %v1258_v1, %v1158_v60  ;;  %v626_v47 = vadd.f32 %v594_v33, %v494_v61  ;;  %v993_v17 = vmul.f32 %v1352_v53, %v2916_v32  ;;  %v1091_v26 = vmax.f32 %v2253_v49, 0.0  ;;  %s3882_s22 = scalar_lea.vmem [#allocation2], %s2124_s21 }
  0xc2   : > { %v1092_v28 = vmax.f32 %v2254_v15, 0.0  ;;  %v1223_v59 = vmax.f32 %v2285_v18, 0.0  ;;  %v1421_v35 = vadd.f32 %v1389_v44, %v1289_v62  ;;  %v760_v48 = vadd.f32 %v728_v13, %v625_v6  ;;  %s1989_s26 = sshll.u32 %s3882_s22, 4  ;;  %s4014_s26 = int_to_ptr.vmem [resolvable:$true] %s1989_s26 }
  0xc3   : > { %v1422_v25 = vadd.f32 %v1390_v43, %v1290_v7  ;;  %v761_v36 = vadd.f32 %v729_v12, %v626_v47  ;;  %v1127_v39 = vmul.f32 %v2976_v8, %v1091_v26  ;;  %v1224_v2 = vmax.f32 %v2286_v51, 0.0  ;;  %s2653_s7 = scalar_lea.vmem %s4014_s26, 2048  ;;  %p2660_p1 = scmp.lt.s32.totalorder %s4014_s26, %s2658_s9 }
  0xc4   : > { %v1128_v37 = vmul.f32 %v2976_v8, %v1092_v28  ;;  %v892_v34 = vadd.f32 %v860_v16, %v760_v48  ;;  %v1355_v46 = vmax.f32 %v2317_v63, 0.0  ;;  %v1356_v42 = vmax.f32 %v2318_v50, 0.0  ;;  %p2654_p12 = scmp.ne.s32.totalorder %s4014_s26, %s2653_s7  ;;  %p2661_p2 = scmp.lt.s32.totalorder %s2659_s10, %s2653_s7 }
  0xc5   : > { %v1439_v4 = vpack.c.bf16 %v1422_v25, %v1421_v35  ;;  %v893_v9 = vadd.f32 %v861_v20, %v761_v36  ;;  %v1259_v21 = vmul.f32 %v2985_v14, %v1223_v59  ;;  %v1260_v41 = vmul.f32 %v2985_v14, %v1224_v2 }
  0xc6   : > { %v1024_v32 = vadd.f32 %v992_v38, %v892_v34  ;;  %v1391_v54 = vmul.f32 %v3001_v24, %v1355_v46  ;;  %v1392_v8 = vmul.f32 %v3001_v24, %v1356_v42  ;;  %p2655_p13 = pnand %p2654_p12, %p2834_p4  ;;  %p2662_p3 = por %p2661_p2, %p2660_p1 }
  0xc7   : > { %2562 = vmatprep.mubr.bf16.mxu1 %v1439_v4  ;;  %v1025_v53 = vadd.f32 %v993_v17, %v893_v9 }
  0xc8   : > { %v1159_v19 = vadd.f32 %v1127_v39, %v1024_v32  ;;  %p2656_p0 = pneg %p2655_p13 }
  0xc9   : > { %v1160_v58 = vadd.f32 %v1128_v37, %v1025_v53 }
  0xca   : > { %v1291_v56 = vadd.f32 %v1259_v21, %v1159_v19  ;;  %p2663_p5 = pnand %p2662_p3, %p2656_p0 }
  0xcb   : > { %v1292_v23 = vadd.f32 %v1260_v41, %v1160_v58 }
  0xcc   : > { %v1423_v31 = vadd.f32 %v1391_v54, %v1291_v56 }
  0xcd   : > { %v1424_v27 = vadd.f32 %v1392_v8, %v1292_v23 }
  0xcf   : > { %v1440_v52 = vpack.c.bf16 %v1424_v27, %v1423_v31 }
  0xd1   : > { %2563 = vmatmul.mubr.bf16.gmra.mrb[12].mxu1 %v1440_v52 }
 0x113   : > { %v3868_v10 = vpop.f32.mrb[0].mxu0 }
 0x114   : > { %v3870_v30 = vpop.f32.mrb[1].mxu0 }
 0x115   : > { %v3872_v14 = vpop.f32.mrb[2].mxu0 }
 0x116   : > { %v2407_v1 = vpack.c.bf16 %v3872_v14, %v3868_v10  ;;  %v3876_v24 = vpop.f32.mrb[3].mxu0 }
 0x117   : > { %v1666_v5 = vadd.f32 %v3876_v24, %v3870_v30  ;;  %v2402_v44 = vpack.c.bf16 %v3876_v24, %v3870_v30 }
 0x118   : > { %2479 = vst [vmem:[%s3882_s22 + $0x8] sm:$0xff] %v2407_v1  }
 0x119   : > { %v1667_v55 = vadd.f32 %v3868_v10, %v1666_v5  ;;  %2403 = vst [vmem:[%s3882_s22] sm:$0xff] %v2402_v44  }
 0x11b   : > { %v1668_v29 = vadd.f32 %v3872_v14, %v1667_v55 }
 0x128   : > { %v3888_v0 = vpop.f32.mrb[4].mxu0 }
 0x129   : > { %v3890_v45 = vpop.f32.mrb[5].mxu0 }
 0x12a   : > { %v1669_v57 = vadd.f32 %v1668_v29, %v3890_v45  ;;  %v3893_v3 = vpop.f32.mrb[6].mxu0 }
 0x12b   : > { %v2417_v43 = vpack.c.bf16 %v3893_v3, %v3888_v0  ;;  %v3897_v40 = vpop.f32.mrb[7].mxu0 }
 0x12c   : > { %v1670_v33 = vadd.f32 %v1669_v57, %v3897_v40  ;;  %v2412_v13 = vpack.c.bf16 %v3897_v40, %v3890_v45 }
 0x12d   : > { %2481 = vst [vmem:[%s3882_s22 + $0x18] sm:$0xff] %v2417_v43  }
 0x12e   : > { %v1671_v11 = vadd.f32 %v3888_v0, %v1670_v33  ;;  %2480 = vst [vmem:[%s3882_s22 + $0x10] sm:$0xff] %v2412_v13  }
 0x130   : > { %v1672_v60 = vadd.f32 %v3893_v3, %v1671_v11 }
 0x13d   : > { %v3906_v22 = vpop.f32.mrb[8].mxu0 }
 0x13e   : > { %v3908_v61 = vpop.f32.mrb[9].mxu0 }
 0x13f   : > { %v1673_v49 = vadd.f32 %v1672_v60, %v3908_v61  ;;  %v3911_v15 = vpop.f32.mrb[10].mxu0 }
 0x140   : > { %v2427_v18 = vpack.c.bf16 %v3911_v15, %v3906_v22  ;;  %v3915_v12 = vpop.f32.mrb[11].mxu0 }
 0x141   : > { %v1674_v16 = vadd.f32 %v1673_v49, %v3915_v12  ;;  %v2422_v20 = vpack.c.bf16 %v3915_v12, %v3908_v61 }
 0x142   : > { %2483 = vst [vmem:[%s3882_s22 + $0x28] sm:$0xff] %v2427_v18  }
 0x143   : > { %v1675_v38 = vadd.f32 %v3906_v22, %v1674_v16  ;;  %2482 = vst [vmem:[%s3882_s22 + $0x20] sm:$0xff] %v2422_v20  }
 0x145   : > { %v1676_v62 = vadd.f32 %v3911_v15, %v1675_v38 }
 0x152   : > { %v3924_v7 = vpop.f32.mrb[12].mxu0 }
 0x153   : > { %v3926_v6 = vpop.f32.mrb[13].mxu0 }
 0x154   : > { %v1677_v47 = vadd.f32 %v1676_v62, %v3926_v6  ;;  %v3929_v51 = vpop.f32.mrb[14].mxu0 }
 0x155   : > { %v2437_v17 = vpack.c.bf16 %v3929_v51, %v3924_v7  ;;  %v3933_v26 = vpop.f32.mrb[15].mxu0 }
 0x156   : > { %v1678_v28 = vadd.f32 %v1677_v47, %v3933_v26  ;;  %v2432_v59 = vpack.c.bf16 %v3933_v26, %v3926_v6 }
 0x157   : > { %2485 = vst [vmem:[%s3882_s22 + $0x38] sm:$0xff] %v2437_v17  }
 0x158   : > { %v1679_v63 = vadd.f32 %v3924_v7, %v1678_v28  ;;  %2484 = vst [vmem:[%s3882_s22 + $0x30] sm:$0xff] %v2432_v59  }
 0x15a   : > { %v1680_v35 = vadd.f32 %v3929_v51, %v1679_v63 }
 0x166   : > { %v3942_v25 = vpop.f32.mrb[0].mxu1 }
 0x167   : > { %v3944_v48 = vpop.f32.mrb[1].mxu1 }
 0x168   : > { %v1681_v36 = vadd.f32 %v1680_v35, %v3944_v48  ;;  %v3947_v50 = vpop.f32.mrb[2].mxu1 }
 0x169   : > { %v2447_v39 = vpack.c.bf16 %v3947_v50, %v3942_v25  ;;  %v3951_v37 = vpop.f32.mrb[3].mxu1 }
 0x16a   : > { %v1682_v2 = vadd.f32 %v1681_v36, %v3951_v37  ;;  %v2442_v4 = vpack.c.bf16 %v3951_v37, %v3944_v48 }
 0x16b   : > { %2487 = vst [vmem:[%s3882_s22 + $0x48] sm:$0xff] %v2447_v39  }
 0x16c   : > { %v1683_v34 = vadd.f32 %v3942_v25, %v1682_v2  ;;  %2486 = vst [vmem:[%s3882_s22 + $0x40] sm:$0xff] %v2442_v4  }
 0x16e   : > { %v1684_v9 = vadd.f32 %v3947_v50, %v1683_v34 }
 0x17b   : > { %v3960_v46 = vpop.f32.mrb[4].mxu1 }
 0x17c   : > { %v3962_v42 = vpop.f32.mrb[5].mxu1 }
 0x17d   : > { %v1685_v32 = vadd.f32 %v1684_v9, %v3962_v42  ;;  %v3965_v53 = vpop.f32.mrb[6].mxu1 }
 0x17e   : > { %v2457_v21 = vpack.c.bf16 %v3965_v53, %v3960_v46  ;;  %v3969_v41 = vpop.f32.mrb[7].mxu1 }
 0x17f   : > { %v1686_v19 = vadd.f32 %v1685_v32, %v3969_v41  ;;  %v2452_v58 = vpack.c.bf16 %v3969_v41, %v3962_v42 }
 0x180   : > { %2489 = vst [vmem:[%s3882_s22 + $0x58] sm:$0xff] %v2457_v21  }
 0x181   : > { %v1687_v54 = vadd.f32 %v3960_v46, %v1686_v19  ;;  %2488 = vst [vmem:[%s3882_s22 + $0x50] sm:$0xff] %v2452_v58  }
 0x183   : > { %v1688_v8 = vadd.f32 %v3965_v53, %v1687_v54 }
 0x18f   : > { %v3978_v56 = vpop.f32.mrb[8].mxu1 }
 0x190   : > { %v3980_v23 = vpop.f32.mrb[9].mxu1 }
 0x191   : > { %v1689_v31 = vadd.f32 %v1688_v8, %v3980_v23  ;;  %v3983_v27 = vpop.f32.mrb[10].mxu1 }
 0x192   : > { %v2467_v52 = vpack.c.bf16 %v3983_v27, %v3978_v56  ;;  %v3987_v1 = vpop.f32.mrb[11].mxu1 }
 0x193   : > { %v1690_v5 = vadd.f32 %v1689_v31, %v3987_v1  ;;  %v2462_v44 = vpack.c.bf16 %v3987_v1, %v3980_v23 }
 0x194   : > { %2491 = vst [vmem:[%s3882_s22 + $0x68] sm:$0xff] %v2467_v52  }
 0x195   : > { %v1691_v55 = vadd.f32 %v3978_v56, %v1690_v5  ;;  %2490 = vst [vmem:[%s3882_s22 + $0x60] sm:$0xff] %v2462_v44  }
 0x197   : > { %v1692_v29 = vadd.f32 %v3983_v27, %v1691_v55 }
 0x1a4   : > { %v3996_v57 = vpop.f32.mrb[12].mxu1 }
 0x1a5   : > { %v4000_v43 = vpop.f32.mrb[13].mxu1 }
 0x1a6   : > { %v1693_v33 = vadd.f32 %v1692_v29, %v4000_v43  ;;  %v4003_v13 = vpop.f32.mrb[14].mxu1 }
 0x1a7   : > { %v2477_v11 = vpack.c.bf16 %v4003_v13, %v3996_v57  ;;  %v4007_v60 = vpop.f32.mrb[15].mxu1 }
 0x1a8   : > { %v1694_v49 = vadd.f32 %v1693_v33, %v4007_v60  ;;  %v2472_v18 = vpack.c.bf16 %v4007_v60, %v4000_v43 }
 0x1a9   : > { %2493 = vst [vmem:[%s3882_s22 + $0x78] sm:$0xff] %v2477_v11  }
 0x1aa   : > { %v1695_v16 = vadd.f32 %v3996_v57, %v1694_v49  ;;  %2492 = vst [vmem:[%s3882_s22 + $0x70] sm:$0xff] %v2472_v18  }
 0x1ab   : > { %2666 = shalt.err (!%p2663_p5)
}
 0x1ac   : > { %s2667_s11 = scalar_lea.hbm %s4012_s5, 2048  ;;  %s2671_s21 = scalar_lea.hbm %s4173_s3, 4096 }
 0x1ad   : > { %p2668_p6 = scmp.ne.s32.totalorder %s4012_s5, %s2667_s11  ;;  %p2672_p10 = scmp.lt.u32.totalorder %s4012_s5, %s4173_s3 }
 0x1ae   : > { %p2673_p11 = scmp.lt.u32.totalorder %s2671_s21, %s2667_s11  ;;  %p2675_p13 = scmp.lt.u32.totalorder %s2667_s11, %s4012_s5 }
 0x1af   : > { %p2669_p7 = pnand %p2668_p6, %p2834_p4 }
 0x1b0   : > { %p2674_p12 = por %p2673_p11, %p2672_p10 }
 0x1b1   : > { %p2670_p9 = pneg %p2669_p7 }
 0x1b2   : > { %p2676_p0 = por %p2675_p13, %p2674_p12 }
 0x1b4   : > { %p2677_p1 = pnand %p2676_p0, %p2670_p9 }
 0x1b6   : > { %2680 = shalt.err (!%p2677_p1)
}
 0x1b7   : > { %s2766_s29 = smov 64   ;;  %s2767_s30 = smov 4   ;;  %v1696_v20 = vadd.f32 %v4003_v13, %v1695_v16  ;;  %vm1805_vm0 = vcmask 1040384  }
 0x1b8   : > { %2583 = dma.vmem_to_hbm [thread:$0]  (%p2834_p4), %s4014_s26, 2048, %s4012_s5, %s1969_s6, %s2766_s29, %s2766_s29, %s2767_s30  }
 0x1b9   : > { %v1697_v38 = vrot.slane %v1696_v20, 4  ;;  %s2125_s26 = sshll.u32 %s3865_s13, 1  ;;  %s2363_s5 = sshll.u32 %s2755_s18, 5 }
 0x1ba   : > { %s217_s6 = scalar_lea.vmem [#allocation4], %s2125_s26  ;;  %s4121_s10 = scalar_lea.hbm %s4174_s4, %s2363_s5 }
 0x1bb   : > { %v1698_v62 = vadd.f32 %v1697_v38, %v1696_v20  ;;  %s2006_s7 = sshll.u32 %s217_s6, 4  ;;  %s1974_s11 = scalar_lea.sflag [#allocation5], %s3865_s13  ;;  %s4123_s7 = int_to_ptr.vmem [resolvable:$true] %s2006_s7 }
 0x1bc   : > { %s2681_s12 = scalar_lea.vmem %s4123_s7, 32  ;;  %s2768_s18 = smov [#allocation4]  }
 0x1bd   : > { %v1699_v47 = vrot.slane %v1698_v62, 2  ;;  %p2682_p2 = scmp.ne.s32.totalorder %s4123_s7, %s2681_s12  ;;  %s2685_s14 = sshll.u32 %s2768_s18, 4  ;;  %s2686_s14 = int_to_ptr.vmem [resolvable:$false] %s2685_s14 }
 0x1be   : > { %s2687_s21 = scalar_lea.vmem %s2686_s14, 64  ;;  %p2688_p6 = scmp.lt.s32.totalorder %s4123_s7, %s2686_s14 }
 0x1bf   : > { %v1700_v17 = vadd.f32 %v1699_v47, %v1698_v62  ;;  %p2683_p3 = pnand %p2682_p2, %p2834_p4  ;;  %p2689_p7 = scmp.lt.s32.totalorder %s2687_s21, %s2681_s12 }
 0x1c1   : > { %v1701_v28 = vrot.slane %v1700_v17, 1  ;;  %p2684_p5 = pneg %p2683_p3  ;;  %p2690_p9 = por %p2689_p7, %p2688_p6 }
 0x1c3   : > { %v4047_v59 = vadd.f32 %v1701_v28, %v1700_v17  ;;  %p2691_p10 = pnand %p2690_p9, %p2684_p5 }
 0x1c5   : > { %v4050_v63 = vmul.f32 0.00390625, %v4047_v59 }
 0x1c7   : > { %v1704_v35 = vsub.f32 %v3870_v30, %v4050_v63  ;;  %v1705_v36 = vsub.f32 %v3876_v24, %v4050_v63  ;;  %v1706_v39 = vsub.f32 %v3868_v10, %v4050_v63  ;;  %v1707_v34 = vsub.f32 %v3872_v14, %v4050_v63 }
 0x1c8   : > { %v1708_v9 = vsub.f32 %v3890_v45, %v4050_v63  ;;  %v1709_v19 = vsub.f32 %v3897_v40, %v4050_v63  ;;  %v1710_v24 = vsub.f32 %v3888_v0, %v4050_v63  ;;  %v1711_v8 = vsub.f32 %v3893_v3, %v4050_v63 }
 0x1c9   : > { %v1736_v2 = vmul.f32 %v1704_v35, %v1704_v35  ;;  %v1737_v4 = vmul.f32 %v1705_v36, %v1705_v36  ;;  %v1738_v32 = vmul.f32 %v1706_v39, %v1706_v39  ;;  %v1739_v30 = vmul.f32 %v1707_v34, %v1707_v34 }
 0x1ca   : > { %v1740_v54 = vmul.f32 %v1708_v9, %v1708_v9  ;;  %v1741_v31 = vmul.f32 %v1709_v19, %v1709_v19  ;;  %v1712_v45 = vsub.f32 %v3908_v61, %v4050_v63  ;;  %v1742_v52 = vmul.f32 %v1710_v24, %v1710_v24 }
 0x1cb   : > { %v1768_v21 = vadd.f32 %v1737_v4, %v1736_v2  ;;  %v1713_v40 = vsub.f32 %v3915_v12, %v4050_v63  ;;  %v1743_v44 = vmul.f32 %v1711_v8, %v1711_v8  ;;  %v1714_v0 = vsub.f32 %v3906_v22, %v4050_v63 }
 0x1cc   : > { %v1744_v29 = vmul.f32 %v1712_v45, %v1712_v45  ;;  %v1715_v3 = vsub.f32 %v3911_v15, %v4050_v63  ;;  %v1716_v61 = vsub.f32 %v3926_v6, %v4050_v63  ;;  %v1717_v12 = vsub.f32 %v3933_v26, %v4050_v63 }
 0x1cd   : > { %v1769_v58 = vadd.f32 %v1768_v21, %v1738_v32  ;;  %v1745_v11 = vmul.f32 %v1713_v40, %v1713_v40  ;;  %v1746_v18 = vmul.f32 %v1714_v0, %v1714_v0  ;;  %v1718_v22 = vsub.f32 %v3924_v7, %v4050_v63 }
 0x1ce   : > { %v1747_v20 = vmul.f32 %v1715_v3, %v1715_v3  ;;  %v1748_v62 = vmul.f32 %v1716_v61, %v1716_v61  ;;  %v1719_v15 = vsub.f32 %v3929_v51, %v4050_v63  ;;  %v1749_v17 = vmul.f32 %v1717_v12, %v1717_v12 }
 0x1cf   : > { %v1770_v10 = vadd.f32 %v1769_v58, %v1739_v30  ;;  %v1720_v6 = vsub.f32 %v3944_v48, %v4050_v63  ;;  %v1750_v35 = vmul.f32 %v1718_v22, %v1718_v22  ;;  %v1721_v26 = vsub.f32 %v3951_v37, %v4050_v63 }
 0x1d0   : > { %v1751_v39 = vmul.f32 %v1719_v15, %v1719_v15  ;;  %v1722_v7 = vsub.f32 %v3942_v25, %v4050_v63  ;;  %v1723_v51 = vsub.f32 %v3947_v50, %v4050_v63  ;;  %v1724_v48 = vsub.f32 %v3962_v42, %v4050_v63 }
 0x1d1   : > { %v1771_v14 = vadd.f32 %v1770_v10, %v1740_v54  ;;  %v1752_v4 = vmul.f32 %v1720_v6, %v1720_v6  ;;  %v1753_v9 = vmul.f32 %v1721_v26, %v1721_v26  ;;  %v1725_v37 = vsub.f32 %v3969_v41, %v4050_v63 }
 0x1d2   : > { %v1754_v21 = vmul.f32 %v1722_v7, %v1722_v7  ;;  %v1755_v30 = vmul.f32 %v1723_v51, %v1723_v51  ;;  %v1726_v25 = vsub.f32 %v3960_v46, %v4050_v63  ;;  %v1756_v24 = vmul.f32 %v1724_v48, %v1724_v48 }
 0x1d3   : > { %v1772_v5 = vadd.f32 %v1771_v14, %v1741_v31  ;;  %v1727_v50 = vsub.f32 %v3965_v53, %v4050_v63  ;;  %v1757_v10 = vmul.f32 %v1725_v37, %v1725_v37  ;;  %v1728_v42 = vsub.f32 %v3980_v23, %v4050_v63 }
 0x1d4   : > { %v1758_v31 = vmul.f32 %v1726_v25, %v1726_v25  ;;  %v1729_v41 = vsub.f32 %v3987_v1, %v4050_v63  ;;  %v1730_v46 = vsub.f32 %v3978_v56, %v4050_v63  ;;  %v1731_v53 = vsub.f32 %v3983_v27, %v4050_v63 }
 0x1d5   : > { %v1773_v55 = vadd.f32 %v1772_v5, %v1742_v52  ;;  %v1759_v45 = vmul.f32 %v1727_v50, %v1727_v50  ;;  %v1760_v5 = vmul.f32 %v1728_v42, %v1728_v42  ;;  %v1732_v23 = vsub.f32 %v4000_v43, %v4050_v63 }
 0x1d6   : > { %v1762_v0 = vmul.f32 %v1730_v46, %v1730_v46  ;;  %v1733_v1 = vsub.f32 %v4007_v60, %v4050_v63  ;;  %v1734_v56 = vsub.f32 %v3996_v57, %v4050_v63  ;;  %v1735_v27 = vsub.f32 %v4003_v13, %v4050_v63 }
 0x1d7   : > { %v1774_v33 = vadd.f32 %v1773_v55, %v1743_v44  ;;  %v1761_v44 = vmul.f32 %v1729_v41, %v1729_v41 }
 0x1d8   : > { %v1765_v61 = vmul.f32 %v1733_v1, %v1733_v1  ;;  %v1766_v43 = vmul.f32 %v1734_v56, %v1734_v56  ;;  %v1767_v12 = vmul.f32 %v1735_v27, %v1735_v27 }
 0x1d9   : > { %v1775_v49 = vadd.f32 %v1774_v33, %v1744_v29  ;;  %v1763_v33 = vmul.f32 %v1731_v53, %v1731_v53 }
 0x1db   : > { %v1776_v16 = vadd.f32 %v1775_v49, %v1745_v11  ;;  %v1764_v11 = vmul.f32 %v1732_v23, %v1732_v23 }
 0x1dd   : > { %v1777_v38 = vadd.f32 %v1776_v16, %v1746_v18 }
 0x1df   : > { %v1778_v47 = vadd.f32 %v1777_v38, %v1747_v20 }
 0x1e1   : > { %v1779_v28 = vadd.f32 %v1778_v47, %v1748_v62 }
 0x1e3   : > { %v1780_v36 = vadd.f32 %v1779_v28, %v1749_v17 }
 0x1e5   : > { %v1781_v2 = vadd.f32 %v1780_v36, %v1750_v35 }
 0x1e7   : > { %v1782_v34 = vadd.f32 %v1781_v2, %v1751_v39 }
 0x1e9   : > { %v1783_v32 = vadd.f32 %v1782_v34, %v1752_v4 }
 0x1eb   : > { %v1784_v19 = vadd.f32 %v1783_v32, %v1753_v9 }
 0x1ed   : > { %v1785_v58 = vadd.f32 %v1784_v19, %v1754_v21 }
 0x1ef   : > { %v1786_v54 = vadd.f32 %v1785_v58, %v1755_v30 }
 0x1f1   : > { %v1787_v8 = vadd.f32 %v1786_v54, %v1756_v24 }
 0x1f3   : > { %v1788_v14 = vadd.f32 %v1787_v8, %v1757_v10 }
 0x1f5   : > { %v1789_v52 = vadd.f32 %v1788_v14, %v1758_v31 }
 0x1f7   : > { %v1790_v40 = vadd.f32 %v1789_v52, %v1759_v45 }
 0x1f9   : > { %v1791_v55 = vadd.f32 %v1790_v40, %v1760_v5 }
 0x1fb   : > { %v1792_v29 = vadd.f32 %v1791_v55, %v1761_v44 }
 0x1fd   : > { %v1793_v3 = vadd.f32 %v1792_v29, %v1762_v0 }
 0x1ff   : > { %v1794_v49 = vadd.f32 %v1793_v3, %v1763_v33 }
 0x201   : > { %v1795_v18 = vadd.f32 %v1794_v49, %v1764_v11 }
 0x203   : > { %v1796_v16 = vadd.f32 %v1795_v18, %v1765_v61 }
 0x205   : > { %v1797_v20 = vadd.f32 %v1796_v16, %v1766_v43 }
 0x207   : > { %v1798_v38 = vadd.f32 %v1797_v20, %v1767_v12 }
 0x209   : > { %v1799_v60 = vrot.slane %v1798_v38, 4 }
 0x20b   : > { %v1800_v22 = vadd.f32 %v1799_v60, %v1798_v38 }
 0x20d   : > { %v1801_v62 = vrot.slane %v1800_v22, 2 }
 0x20f   : > { %v1802_v57 = vadd.f32 %v1801_v62, %v1800_v22 }
 0x211   : > { %v1803_v47 = vrot.slane %v1802_v57, 1 }
 0x213   : > { %v1804_v13 = vadd.f32 %v1803_v47, %v1802_v57 }
 0x215   : > { %v1806_v63 = vsel %vm1805_vm0, %v4047_v59, %v1804_v13 }
 0x216   : > { %1807 = vst [vmem:[%s217_s6] sm:$0x3] %v1806_v63 }
 0x217   : > { %2694 = shalt.err (!%p2691_p10)
}
 0x218   : > { %s2695_s13 = scalar_lea.hbm %s4121_s10, 32  ;;  %s2699_s29 = scalar_lea.hbm %s4174_s4, 64 }
 0x219   : > { %p2696_p11 = scmp.ne.s32.totalorder %s4121_s10, %s2695_s13  ;;  %p2700_p0 = scmp.lt.u32.totalorder %s4121_s10, %s4174_s4 }
 0x21a   : > { %p2701_p1 = scmp.lt.u32.totalorder %s2699_s29, %s2695_s13  ;;  %p2703_p3 = scmp.lt.u32.totalorder %s2695_s13, %s4121_s10 }
 0x21b   : > { %p2697_p12 = pnand %p2696_p11, %p2834_p4 }
 0x21c   : > { %p2702_p2 = por %p2701_p1, %p2700_p0 }
 0x21d   : > { %p2698_p13 = pneg %p2697_p12 }
 0x21e   : > { %p2704_p5 = por %p2703_p3, %p2702_p2 }
 0x220   : > { %p2705_p6 = pnand %p2704_p5, %p2698_p13 }
 0x222   : > { %2708 = shalt.err (!%p2705_p6)
}
 0x223   : > { %2584 = dma.vmem_to_hbm [thread:$0]  (%p2834_p4), %s4123_s7, 32, %s4121_s10, %s1974_s11  }
 0x224 PF: > { %p2594_p7 = scmp.ge.s32.totalorder %s2763_s20, 2  ;;  %s2018_s5 = sand.u32 1, %s2743_s15  }
 0x225   : > { %s2019_s6 = scalar_lea.sflag [#allocation3], %s2018_s5 }
 0x226   : > { %p2588_p9 = pnand %p2594_p7, %p2841_p8 }
 0x228   : > { %2734 = dma.done.wait (!%p2588_p9), %s2019_s6, 2048  }
 0x229   : > { %2736 = vsyncadd (!%p2588_p9), %s2019_s6, 4294965248  ;;  %s2028_s8 = scalar_lea.sflag [#allocation5], %s2018_s5 }
 0x22a   : > { %2738 = dma.done.wait (!%p2588_p9), %s2028_s8, 32  }
 0x22b   : > { %2740 = vsyncadd (!%p2588_p9), %s2028_s8, 4294967264  ;;  %s21_s20 = sadd.s32 1, %s2763_s20   ;;  %s4177_s15 = smov %s2747_s16 }
 0x22c   : > { %p18_p10 = scmp.ge.s32.totalorder %s21_s20, 4   ;;  %s4178_s16 = smov %s2751_s17 }
 0x22d   : > { %s4179_s17 = smov %s2847_s28  ;;  %s4180_s18 = smov %s2759_s19 }
 0x22e   : > { %s4181_s19 = smov %s4183_s23  ;;  %20 = sbr.rel (!%p18_p10) target bundleno = 6 (0x6), region = 87 }
 0x235   :  { %2033 = vsyncpa [#allocation3], 1 }
 0x236   :  { %2035 = vsyncpa [#allocation3 + $0x1], 1 }
 0x237   :  { %2036 = vsyncpa [#allocation5], 1 }
 0x238   :  { %2038 = vsyncpa [#allocation5 + $0x1], 1 }

</bundles_post_ra>
